<compile_context>
chip_gen: v7x
topology: tpu7x:2x2x1
jax: 0.10.0
libtpu: 0.0.40
codegen_flags: <defaults>
</compile_context>

<pallas_src>
import numpy as np
import jax
import jax.numpy as jnp
from jax.experimental import pallas as pl
from jax.experimental.pallas import tpu as pltpu


# ----------------------------------------------------------------------------- pooling matrices
def _adaptive_pool_matrix(in_size: int, out_size: int) -> np.ndarray:
    """P[i, r] = 1/len(window_i) if r in window_i else 0 (PyTorch adaptive-avg-pool rule)."""
    idx = np.arange(out_size)
    starts = (idx * in_size) // out_size
    ends = -((-(idx + 1) * in_size) // out_size)  # ceil((i+1)*in/out)
    P = np.zeros((out_size, in_size), dtype=np.float32)
    for i in range(out_size):
        P[i, starts[i]:ends[i]] = 1.0 / float(ends[i] - starts[i])
    return P


def _kron_pool_matrix_T(H: int, W: int, t_H: int, t_W: int, C: int) -> jnp.ndarray:
    """[H*W, t_H*t_W]: kron(P_h, P_w).T with the 1/C channel-mean scale folded in."""
    P_h = _adaptive_pool_matrix(H, t_H)          # [t_H, H]
    P_w = _adaptive_pool_matrix(W, t_W)          # [t_W, W]
    K = np.kron(P_h, P_w) / float(C)             # [t_H*t_W, H*W]
    return jnp.asarray(K.T)                      # [H*W, t_H*t_W]


# ----------------------------------------------------------------------------- fused sampler + key kernel
def _make_fused_kernel(s: int, nt: int):
    """grid=(s,): step i processes student feature i for the whole batch."""

    def kernel(*refs):
        x_refs = refs[:s]                                              # [bs, C_i, H_i*W_i]
        kron_refs = [refs[s + i * nt: s + (i + 1) * nt] for i in range(s)]
        w_refs = refs[s + s * nt: s + s * nt + s]                      # [C_i, qk]
        b_ref, g_ref, be_ref = refs[s + s * nt + s: s + s * nt + s + 3]  # [1, 1, qk] blocks
        out_refs = refs[s + s * nt + s + 3:]
        value_refs = out_refs[:nt]                                     # blocks [1, bs, tHW_j]
        key_ref = out_refs[nt]                                         # block  [1, bs, qk]

        f = pl.program_id(0)

        def make_branch(i):
            def branch():
                x = x_refs[i][...].astype(jnp.float32)                 # [bs, C_i, HW_i]

                # --- Sample: sum of squares over channels, then Kronecker adaptive-avg-pool ---
                ssq = jnp.sum(x * x, axis=1)                           # [bs, HW_i]
                for j in range(nt):
                    pooled = jnp.dot(ssq, kron_refs[i][j][...],        # [bs, tHW_j]
                                     preferred_element_type=jnp.float32)
                    nrm = jnp.sqrt(jnp.sum(pooled * pooled, axis=-1, keepdims=True))
                    value_refs[j][0] = pooled / jnp.maximum(nrm, 1e-12)  # F.normalize(dim=-1)

                # --- key layer: channel mean -> Linear -> BatchNorm (batch stats) -> ReLU ---
                cm = jnp.mean(x, axis=2)                               # [bs, C_i]
                y = jnp.dot(cm, w_refs[i][...],
                            preferred_element_type=jnp.float32) + b_ref[0]
                mu = jnp.mean(y, axis=0, keepdims=True)
                var = jnp.mean(jnp.square(y - mu), axis=0, keepdims=True)
                yn = (y - mu) / jnp.sqrt(var + 1e-5)
                key_ref[0] = jnp.maximum(yn * g_ref[0] + be_ref[0], 0.0)

            return branch

        for i in range(s):
            pl.when(f == i)(make_branch(i))

    return kernel


# ----------------------------------------------------------------------------- bilinear kernel
def _bilinear_kernel(k_ref, w_ref, b_ref, g_ref, be_ref, o_ref):
    k = k_ref[...].astype(jnp.float32)                                 # [bs*s, qk]
    y = jnp.dot(k, w_ref[...], preferred_element_type=jnp.float32) + b_ref[...]
    mu = jnp.mean(y, axis=0, keepdims=True)
    var = jnp.mean(jnp.square(y - mu), axis=0, keepdims=True)
    yn = (y - mu) / jnp.sqrt(var + 1e-5)
    o_ref[...] = (yn * g_ref[...] + be_ref[...]).astype(o_ref.dtype)   # relu=False


# ----------------------------------------------------------------------------- wrapper
def linear_transform_student_forward(g_s, params, t_spatial, qk_dim):
    """Returns (bilinear_key [bs, s, t, qk], value: list of [bs, s, tH_j*tW_j])."""
    bs = g_s[0].shape[0]
    s = len(g_s)
    nt = len(t_spatial)
    Cs = [f.shape[1] for f in g_s]
    HWs = [f.shape[2] * f.shape[3] for f in g_s]
    tHWs = [th * tw for (th, tw) in t_spatial]

    # host-built pooling matrices (pre-transposed, 1/C folded in)
    krons = [[_kron_pool_matrix_T(g_s[i].shape[2], g_s[i].shape[3], th, tw, Cs[i])
              for (th, tw) in t_spatial] for i in range(s)]

    # free contiguous reshape; keep native dtype (kernel upcasts)
    xs = [g_s[i].reshape(bs, Cs[i], HWs[i]) for i in range(s)]

    inputs = list(xs)
    for i in range(s):
        inputs.extend(krons[i])
    inputs.extend(params["key_w"])              # s tensors [C_i, qk]
    inputs.append(params["key_b"])              # [s, 1, qk]
    inputs.append(params["key_gamma"])          # [s, 1, qk]
    inputs.append(params["key_beta"])           # [s, 1, qk]

    in_specs = []
    for i in range(s):
        in_specs.append(pl.BlockSpec((bs, Cs[i], HWs[i]), lambda f: (0, 0, 0)))
    for i in range(s):
        for j in range(nt):
            in_specs.append(pl.BlockSpec((HWs[i], tHWs[j]), lambda f: (0, 0)))
    for i in range(s):
        in_specs.append(pl.BlockSpec((Cs[i], qk_dim), lambda f: (0, 0)))
    for _ in range(3):
        in_specs.append(pl.BlockSpec((1, 1, qk_dim), lambda f: (f, 0, 0)))

    out_specs = [pl.BlockSpec((1, bs, tHWs[j]), lambda f: (f, 0, 0)) for j in range(nt)]
    out_specs.append(pl.BlockSpec((1, bs, qk_dim), lambda f: (f, 0, 0)))

    out_shape = tuple(
        [jax.ShapeDtypeStruct((s, bs, tHWs[j]), jnp.float32) for j in range(nt)]
        + [jax.ShapeDtypeStruct((s, bs, qk_dim), jnp.float32)]
    )

    outs = pl.pallas_call(
        _make_fused_kernel(s, nt),
        out_shape=out_shape,
        grid_spec=pltpu.PrefetchScalarGridSpec(
            num_scalar_prefetch=0, grid=(s,),
            in_specs=in_specs, out_specs=out_specs),
        compiler_params=pltpu.CompilerParams(dimension_semantics=("parallel",)),
    )(*inputs)

    value_raw = outs[:nt]           # [s, bs, tHW_j]
    key_raw = outs[nt]              # [s, bs, qk]

    values = [jnp.transpose(v, (1, 0, 2)) for v in value_raw]           # [bs, s, tHW_j]
    key2d = jnp.transpose(key_raw, (1, 0, 2)).reshape(bs * s, qk_dim)   # stack(dim=1).view(bs*s,-1)

    t = params["bil_w"].shape[1] // qk_dim
    bil = pl.pallas_call(
        _bilinear_kernel,
        out_shape=jax.ShapeDtypeStruct((bs * s, qk_dim * t), jnp.float32),
        grid_spec=pltpu.PrefetchScalarGridSpec(
            num_scalar_prefetch=0, grid=(1,),
            in_specs=[
                pl.BlockSpec((bs * s, qk_dim), lambda i: (0, 0)),
                pl.BlockSpec((qk_dim, qk_dim * t), lambda i: (0, 0)),
                pl.BlockSpec((1, qk_dim * t), lambda i: (0, 0)),
                pl.BlockSpec((1, qk_dim * t), lambda i: (0, 0)),
                pl.BlockSpec((1, qk_dim * t), lambda i: (0, 0)),
            ],
            out_specs=pl.BlockSpec((bs * s, qk_dim * t), lambda i: (0, 0))),
        compiler_params=pltpu.CompilerParams(dimension_semantics=("arbitrary",)),
    )(key2d, params["bil_w"], params["bil_b"], params["bil_gamma"], params["bil_beta"])

    bilinear_key = bil.reshape(bs, s, t, qk_dim)
    return bilinear_key, values


# ----------------------------------------------------------------------------- pure-JAX reference
def _reference(g_s, params, t_spatial, qk_dim):
    bs = g_s[0].shape[0]
    s = len(g_s)
    t = params["bil_w"].shape[1] // qk_dim

    values = []
    for (tH, tW) in t_spatial:
        feats = []
        for f in g_s:
            m = jnp.mean(f.astype(jnp.float32) ** 2, axis=1)            # [bs, H, W]
            H, W = f.shape[2], f.shape[3]
            Ph = jnp.asarray(_adaptive_pool_matrix(H, tH))
            Pw = jnp.asarray(_adaptive_pool_matrix(W, tW))
            pooled = jnp.einsum("ih,bhw,jw->bij", Ph, m, Pw).reshape(bs, -1)
            feats.append(pooled)
        sm = jnp.stack(feats, axis=1)                                   # [bs, s, tHW]
        nrm = jnp.sqrt(jnp.sum(sm * sm, axis=2, keepdims=True))
        values.append(sm / jnp.maximum(nrm, 1e-12))

    keys = []
    for i, f in enumerate(g_s):
        cm = jnp.mean(jnp.mean(f.astype(jnp.float32), axis=3), axis=2)  # [bs, C]
        y = cm @ params["key_w"][i] + params["key_b"][i]
        mu = jnp.mean(y, axis=0, keepdims=True)
        var = jnp.mean((y - mu) ** 2, axis=0, keepdims=True)
        yn = (y - mu) / jnp.sqrt(var + 1e-5)
        keys.append(jnp.maximum(yn * params["key_gamma"][i] + params["key_beta"][i], 0.0))
    key2d = jnp.stack(keys, axis=1).reshape(bs * s, qk_dim)

    y = key2d @ params["bil_w"] + params["bil_b"]
    mu = jnp.mean(y, axis=0, keepdims=True)
    var = jnp.mean((y - mu) ** 2, axis=0, keepdims=True)
    yn = (y - mu) / jnp.sqrt(var + 1e-5)
    bk = (yn * params["bil_gamma"] + params["bil_beta"]).reshape(bs, s, t, qk_dim)
    return bk, values


# ----------------------------------------------------------------------------- demo / check
if __name__ == "__main__":
    root = jax.random.PRNGKey(0)
    ks = jax.random.split(root, 16)

    bs = 2
    qk_dim = 16
    s_shapes = [(bs, 4, 16, 16), (bs, 8, 8, 8), (bs, 16, 4, 4)]   # student features (NCHW)
    t_spatial = [(8, 8), (4, 4)]                                   # unique teacher (t_H, t_W)
    s = len(s_shapes)
    t = len(t_spatial)                                             # t_shapes == unique here

    g_s = [jax.random.normal(ks[i], shp, dtype=jnp.float32) for i, shp in enumerate(s_shapes)]

    params = {
        "key_w": [0.3 * jax.random.normal(ks[3 + i], (shp[1], qk_dim), dtype=jnp.float32)
                  for i, shp in enumerate(s_shapes)],
        "key_b": 0.1 * jax.random.normal(ks[6], (s, 1, qk_dim), dtype=jnp.float32),
        "key_gamma": 1.0 + 0.1 * jax.random.normal(ks[7], (s, 1, qk_dim), dtype=jnp.float32),
        "key_beta": 0.1 * jax.random.normal(ks[8], (s, 1, qk_dim), dtype=jnp.float32),
        "bil_w": 0.3 * jax.random.normal(ks[9], (qk_dim, qk_dim * t), dtype=jnp.float32),
        "bil_b": 0.1 * jax.random.normal(ks[10], (1, qk_dim * t), dtype=jnp.float32),
        "bil_gamma": 1.0 + 0.1 * jax.random.normal(ks[11], (1, qk_dim * t), dtype=jnp.float32),
        "bil_beta": 0.1 * jax.random.normal(ks[12], (1, qk_dim * t), dtype=jnp.float32),
    }

    bilinear_key, values = linear_transform_student_forward(g_s, params, t_spatial, qk_dim)
    jax.block_until_ready((bilinear_key, values))

    ref_bk, ref_values = _reference(g_s, params, t_spatial, qk_dim)

    assert bilinear_key.shape == (bs, s, t, qk_dim), bilinear_key.shape
    for j, (tH, tW) in enumerate(t_spatial):
        assert values[j].shape == (bs, s, tH * tW), values[j].shape

    np.testing.assert_allclose(np.asarray(bilinear_key), np.asarray(ref_bk), rtol=1e-4, atol=1e-5)
    for a, b in zip(values, ref_values):
        np.testing.assert_allclose(np.asarray(a), np.asarray(b), rtol=1e-4, atol=1e-5)

    print("KERNEL_OK")
</pallas_src>

<mosaic_0001>
module attributes {stable_mosaic.version = 11 : i64} {
  func.func @kernel(%arg0: i32, %arg1: memref<2x4x256xf32, #tpu.memory_space<vmem>>, %arg2: memref<2x8x64xf32, #tpu.memory_space<vmem>>, %arg3: memref<2x16x16xf32, #tpu.memory_space<vmem>>, %arg4: memref<256x64xf32, #tpu.memory_space<vmem>>, %arg5: memref<256x16xf32, #tpu.memory_space<vmem>>, %arg6: memref<64x64xf32, #tpu.memory_space<vmem>>, %arg7: memref<64x16xf32, #tpu.memory_space<vmem>>, %arg8: memref<16x64xf32, #tpu.memory_space<vmem>>, %arg9: memref<16x16xf32, #tpu.memory_space<vmem>>, %arg10: memref<4x16xf32, #tpu.memory_space<vmem>>, %arg11: memref<8x16xf32, #tpu.memory_space<vmem>>, %arg12: memref<16x16xf32, #tpu.memory_space<vmem>>, %arg13: memref<1x1x16xf32, #tpu.memory_space<vmem>>, %arg14: memref<1x1x16xf32, #tpu.memory_space<vmem>>, %arg15: memref<1x1x16xf32, #tpu.memory_space<vmem>>, %arg16: memref<1x2x64xf32, #tpu.memory_space<vmem>>, %arg17: memref<1x2x16xf32, #tpu.memory_space<vmem>>, %arg18: memref<1x2x16xf32, #tpu.memory_space<vmem>>) attributes {dimension_semantics = [#tpu.dimension_semantics<parallel>], iteration_bounds = array<i64: 3>, scalar_prefetch = 0 : i64, scratch_operands = 0 : i64, tpu.core_type = #tpu.core_type<tc>, window_params = [{pipeline_mode = #tpu.pipeline_mode<synchronous>, transform_indices = @transform_0, window_bounds = array<i64: 2, 4, 256>}, {pipeline_mode = #tpu.pipeline_mode<synchronous>, transform_indices = @transform_1, window_bounds = array<i64: 2, 8, 64>}, {pipeline_mode = #tpu.pipeline_mode<synchronous>, transform_indices = @transform_2, window_bounds = array<i64: 2, 16, 16>}, {pipeline_mode = #tpu.pipeline_mode<synchronous>, transform_indices = @transform_3, window_bounds = array<i64: 256, 64>}, {pipeline_mode = #tpu.pipeline_mode<synchronous>, transform_indices = @transform_4, window_bounds = array<i64: 256, 16>}, {pipeline_mode = #tpu.pipeline_mode<synchronous>, transform_indices = @transform_5, window_bounds = array<i64: 64, 64>}, {pipeline_mode = #tpu.pipeline_mode<synchronous>, transform_indices = @transform_6, window_bounds = array<i64: 64, 16>}, {pipeline_mode = #tpu.pipeline_mode<synchronous>, transform_indices = @transform_7, window_bounds = array<i64: 16, 64>}, {pipeline_mode = #tpu.pipeline_mode<synchronous>, transform_indices = @transform_8, window_bounds = array<i64: 16, 16>}, {pipeline_mode = #tpu.pipeline_mode<synchronous>, transform_indices = @transform_9, window_bounds = array<i64: 4, 16>}, {pipeline_mode = #tpu.pipeline_mode<synchronous>, transform_indices = @transform_10, window_bounds = array<i64: 8, 16>}, {pipeline_mode = #tpu.pipeline_mode<synchronous>, transform_indices = @transform_11, window_bounds = array<i64: 16, 16>}, {transform_indices = @transform_12, window_bounds = array<i64: 1, 1, 16>}, {transform_indices = @transform_13, window_bounds = array<i64: 1, 1, 16>}, {transform_indices = @transform_14, window_bounds = array<i64: 1, 1, 16>}, {transform_indices = @transform_15, window_bounds = array<i64: 1, 2, 64>}, {transform_indices = @transform_16, window_bounds = array<i64: 1, 2, 16>}, {transform_indices = @transform_17, window_bounds = array<i64: 1, 2, 16>}]} {
    %c0_i32 = arith.constant 0 : i32
    %0 = arith.cmpi eq, %arg0, %c0_i32 : i32
    %1 = arith.extui %0 : i1 to i32
    %c0_i32_0 = arith.constant 0 : i32
    %2 = arith.cmpi ne, %1, %c0_i32_0 : i32
    scf.if %2 {
      %c0 = arith.constant 0 : index
      %c0_3 = arith.constant 0 : index
      %c0_4 = arith.constant 0 : index
      %9 = vector.load %arg1[%c0, %c0_3, %c0_4] : memref<2x4x256xf32, #tpu.memory_space<vmem>>, vector<2x4x256xf32>
      %10 = arith.mulf %9, %9 : vector<2x4x256xf32>
      %cst = arith.constant dense<0.000000e+00> : vector<2x256xf32>
      %11 = vector.multi_reduction <add>, %10, %cst [1] : vector<2x4x256xf32> to vector<2x256xf32>
      %c0_5 = arith.constant 0 : index
      %c0_6 = arith.constant 0 : index
      %12 = vector.load %arg4[%c0_5, %c0_6] : memref<256x64xf32, #tpu.memory_space<vmem>>, vector<256x64xf32>
      %cst_7 = arith.constant dense<0.000000e+00> : vector<2x64xf32>
      %13 = tpu.matmul %11, %12, %cst_7 {dimension_numbers = #tpu.dot_dimension_numbers<[1], [0], [0], [1], [0, 0, 1, 1], [], []>} : vector<2x256xf32>, vector<256x64xf32>, vector<2x64xf32> -> vector<2x64xf32>
      %14 = arith.mulf %13, %13 : vector<2x64xf32>
      %cst_8 = arith.constant dense<0.000000e+00> : vector<2xf32>
      %15 = vector.multi_reduction <add>, %14, %cst_8 [1] : vector<2x64xf32> to vector<2xf32>
      %16 = vector.shape_cast %15 : vector<2xf32> to vector<2x1xf32>
      %17 = math.sqrt %16 : vector<2x1xf32>
      %cst_9 = arith.constant 9.99999996E-13 : f32
      %18 = vector.broadcast %cst_9 : f32 to vector<2x1xf32>
      %19 = arith.maximumf %17, %18 : vector<2x1xf32>
      %20 = vector.broadcast %19 : vector<2x1xf32> to vector<2x64xf32>
      %21 = arith.divf %13, %20 : vector<2x64xf32>
      %c0_10 = arith.constant 0 : index
      %c0_11 = arith.constant 0 : index
      %c0_12 = arith.constant 0 : index
      %22 = vector.load %arg16[%c0_10, %c0_11, %c0_12] : memref<1x2x64xf32, #tpu.memory_space<vmem>>, vector<1x2x64xf32>
      %23 = vector.shape_cast %22 : vector<1x2x64xf32> to vector<2x64xf32>
      %24 = vector.shape_cast %21 : vector<2x64xf32> to vector<1x2x64xf32>
      tpu.vector_store %arg16[%c0_10, %c0_11, %c0_12], %24 {strides = array<i32>} : memref<1x2x64xf32, #tpu.memory_space<vmem>>, vector<1x2x64xf32>,
      %c0_13 = arith.constant 0 : index
      %c0_14 = arith.constant 0 : index
      %25 = vector.load %arg5[%c0_13, %c0_14] : memref<256x16xf32, #tpu.memory_space<vmem>>, vector<256x16xf32>
      %cst_15 = arith.constant dense<0.000000e+00> : vector<2x16xf32>
      %26 = tpu.matmul %11, %25, %cst_15 {dimension_numbers = #tpu.dot_dimension_numbers<[1], [0], [0], [1], [0, 0, 1, 1], [], []>} : vector<2x256xf32>, vector<256x16xf32>, vector<2x16xf32> -> vector<2x16xf32>
      %27 = arith.mulf %26, %26 : vector<2x16xf32>
      %cst_16 = arith.constant dense<0.000000e+00> : vector<2xf32>
      %28 = vector.multi_reduction <add>, %27, %cst_16 [1] : vector<2x16xf32> to vector<2xf32>
      %29 = vector.shape_cast %28 : vector<2xf32> to vector<2x1xf32>
      %30 = math.sqrt %29 : vector<2x1xf32>
      %cst_17 = arith.constant 9.99999996E-13 : f32
      %31 = vector.broadcast %cst_17 : f32 to vector<2x1xf32>
      %32 = arith.maximumf %30, %31 : vector<2x1xf32>
      %33 = vector.broadcast %32 : vector<2x1xf32> to vector<2x16xf32>
      %34 = arith.divf %26, %33 : vector<2x16xf32>
      %c0_18 = arith.constant 0 : index
      %c0_19 = arith.constant 0 : index
      %c0_20 = arith.constant 0 : index
      %35 = vector.load %arg17[%c0_18, %c0_19, %c0_20] : memref<1x2x16xf32, #tpu.memory_space<vmem>>, vector<1x2x16xf32>
      %36 = vector.shape_cast %35 : vector<1x2x16xf32> to vector<2x16xf32>
      %37 = vector.shape_cast %34 : vector<2x16xf32> to vector<1x2x16xf32>
      tpu.vector_store %arg17[%c0_18, %c0_19, %c0_20], %37 {strides = array<i32>} : memref<1x2x16xf32, #tpu.memory_space<vmem>>, vector<1x2x16xf32>,
      %cst_21 = arith.constant dense<0.000000e+00> : vector<2x4xf32>
      %38 = vector.multi_reduction <add>, %9, %cst_21 [2] : vector<2x4x256xf32> to vector<2x4xf32>
      %cst_22 = arith.constant 2.560000e+02 : f32
      %39 = vector.broadcast %cst_22 : f32 to vector<2x4xf32>
      %40 = arith.divf %38, %39 : vector<2x4xf32>
      %c0_23 = arith.constant 0 : index
      %c0_24 = arith.constant 0 : index
      %41 = vector.load %arg10[%c0_23, %c0_24] : memref<4x16xf32, #tpu.memory_space<vmem>>, vector<4x16xf32>
      %cst_25 = arith.constant dense<0.000000e+00> : vector<2x16xf32>
      %42 = tpu.matmul %40, %41, %cst_25 {dimension_numbers = #tpu.dot_dimension_numbers<[1], [0], [0], [1], [0, 0, 1, 1], [], []>} : vector<2x4xf32>, vector<4x16xf32>, vector<2x16xf32> -> vector<2x16xf32>
      %c0_26 = arith.constant 0 : index
      %c0_27 = arith.constant 0 : index
      %c0_28 = arith.constant 0 : index
      %43 = vector.load %arg13[%c0_26, %c0_27, %c0_28] : memref<1x1x16xf32, #tpu.memory_space<vmem>>, vector<1x1x16xf32>
      %44 = vector.shape_cast %43 : vector<1x1x16xf32> to vector<1x16xf32>
      %45 = vector.broadcast %44 : vector<1x16xf32> to vector<2x16xf32>
      %46 = arith.addf %42, %45 : vector<2x16xf32>
      %cst_29 = arith.constant dense<0.000000e+00> : vector<16xf32>
      %47 = vector.multi_reduction <add>, %46, %cst_29 [0] : vector<2x16xf32> to vector<16xf32>
      %48 = vector.shape_cast %47 : vector<16xf32> to vector<1x16xf32>
      %cst_30 = arith.constant 2.000000e+00 : f32
      %49 = vector.broadcast %cst_30 : f32 to vector<1x16xf32>
      %50 = arith.divf %48, %49 : vector<1x16xf32>
      %51 = vector.broadcast %50 : vector<1x16xf32> to vector<2x16xf32>
      %52 = arith.subf %46, %51 : vector<2x16xf32>
      %53 = arith.mulf %52, %52 : vector<2x16xf32>
      %cst_31 = arith.constant dense<0.000000e+00> : vector<16xf32>
      %54 = vector.multi_reduction <add>, %53, %cst_31 [0] : vector<2x16xf32> to vector<16xf32>
      %55 = vector.shape_cast %54 : vector<16xf32> to vector<1x16xf32>
      %cst_32 = arith.constant 2.000000e+00 : f32
      %56 = vector.broadcast %cst_32 : f32 to vector<1x16xf32>
      %57 = arith.divf %55, %56 : vector<1x16xf32>
      %58 = vector.broadcast %50 : vector<1x16xf32> to vector<2x16xf32>
      %59 = arith.subf %46, %58 : vector<2x16xf32>
      %cst_33 = arith.constant 9.99999974E-6 : f32
      %60 = vector.broadcast %cst_33 : f32 to vector<1x16xf32>
      %61 = arith.addf %57, %60 : vector<1x16xf32>
      %62 = math.sqrt %61 : vector<1x16xf32>
      %63 = vector.broadcast %62 : vector<1x16xf32> to vector<2x16xf32>
      %64 = arith.divf %59, %63 : vector<2x16xf32>
      %c0_34 = arith.constant 0 : index
      %c0_35 = arith.constant 0 : index
      %c0_36 = arith.constant 0 : index
      %65 = vector.load %arg14[%c0_34, %c0_35, %c0_36] : memref<1x1x16xf32, #tpu.memory_space<vmem>>, vector<1x1x16xf32>
      %66 = vector.shape_cast %65 : vector<1x1x16xf32> to vector<1x16xf32>
      %67 = vector.broadcast %66 : vector<1x16xf32> to vector<2x16xf32>
      %68 = arith.mulf %64, %67 : vector<2x16xf32>
      %c0_37 = arith.constant 0 : index
      %c0_38 = arith.constant 0 : index
      %c0_39 = arith.constant 0 : index
      %69 = vector.load %arg15[%c0_37, %c0_38, %c0_39] : memref<1x1x16xf32, #tpu.memory_space<vmem>>, vector<1x1x16xf32>
      %70 = vector.shape_cast %69 : vector<1x1x16xf32> to vector<1x16xf32>
      %71 = vector.broadcast %70 : vector<1x16xf32> to vector<2x16xf32>
      %72 = arith.addf %68, %71 : vector<2x16xf32>
      %cst_40 = arith.constant 0.000000e+00 : f32
      %73 = vector.broadcast %cst_40 : f32 to vector<2x16xf32>
      %74 = arith.maximumf %72, %73 : vector<2x16xf32>
      %c0_41 = arith.constant 0 : index
      %c0_42 = arith.constant 0 : index
      %c0_43 = arith.constant 0 : index
      %75 = vector.load %arg18[%c0_41, %c0_42, %c0_43] : memref<1x2x16xf32, #tpu.memory_space<vmem>>, vector<1x2x16xf32>
      %76 = vector.shape_cast %75 : vector<1x2x16xf32> to vector<2x16xf32>
      %77 = vector.shape_cast %74 : vector<2x16xf32> to vector<1x2x16xf32>
      tpu.vector_store %arg18[%c0_41, %c0_42, %c0_43], %77 {strides = array<i32>} : memref<1x2x16xf32, #tpu.memory_space<vmem>>, vector<1x2x16xf32>,
    } else {
    }
    %c1_i32 = arith.constant 1 : i32
    %3 = arith.cmpi eq, %arg0, %c1_i32 : i32
    %4 = arith.extui %3 : i1 to i32
    %c0_i32_1 = arith.constant 0 : i32
    %5 = arith.cmpi ne, %4, %c0_i32_1 : i32
    scf.if %5 {
      %c0 = arith.constant 0 : index
      %c0_3 = arith.constant 0 : index
      %c0_4 = arith.constant 0 : index
      %9 = vector.load %arg2[%c0, %c0_3, %c0_4] : memref<2x8x64xf32, #tpu.memory_space<vmem>>, vector<2x8x64xf32>
      %10 = arith.mulf %9, %9 : vector<2x8x64xf32>
      %cst = arith.constant dense<0.000000e+00> : vector<2x64xf32>
      %11 = vector.multi_reduction <add>, %10, %cst [1] : vector<2x8x64xf32> to vector<2x64xf32>
      %c0_5 = arith.constant 0 : index
      %c0_6 = arith.constant 0 : index
      %12 = vector.load %arg6[%c0_5, %c0_6] : memref<64x64xf32, #tpu.memory_space<vmem>>, vector<64x64xf32>
      %cst_7 = arith.constant dense<0.000000e+00> : vector<2x64xf32>
      %13 = tpu.matmul %11, %12, %cst_7 {dimension_numbers = #tpu.dot_dimension_numbers<[1], [0], [0], [1], [0, 0, 1, 1], [], []>} : vector<2x64xf32>, vector<64x64xf32>, vector<2x64xf32> -> vector<2x64xf32>
      %14 = arith.mulf %13, %13 : vector<2x64xf32>
      %cst_8 = arith.constant dense<0.000000e+00> : vector<2xf32>
      %15 = vector.multi_reduction <add>, %14, %cst_8 [1] : vector<2x64xf32> to vector<2xf32>
      %16 = vector.shape_cast %15 : vector<2xf32> to vector<2x1xf32>
      %17 = math.sqrt %16 : vector<2x1xf32>
      %cst_9 = arith.constant 9.99999996E-13 : f32
      %18 = vector.broadcast %cst_9 : f32 to vector<2x1xf32>
      %19 = arith.maximumf %17, %18 : vector<2x1xf32>
      %20 = vector.broadcast %19 : vector<2x1xf32> to vector<2x64xf32>
      %21 = arith.divf %13, %20 : vector<2x64xf32>
      %c0_10 = arith.constant 0 : index
      %c0_11 = arith.constant 0 : index
      %c0_12 = arith.constant 0 : index
      %22 = vector.load %arg16[%c0_10, %c0_11, %c0_12] : memref<1x2x64xf32, #tpu.memory_space<vmem>>, vector<1x2x64xf32>
      %23 = vector.shape_cast %22 : vector<1x2x64xf32> to vector<2x64xf32>
      %24 = vector.shape_cast %21 : vector<2x64xf32> to vector<1x2x64xf32>
      tpu.vector_store %arg16[%c0_10, %c0_11, %c0_12], %24 {strides = array<i32>} : memref<1x2x64xf32, #tpu.memory_space<vmem>>, vector<1x2x64xf32>,
      %c0_13 = arith.constant 0 : index
      %c0_14 = arith.constant 0 : index
      %25 = vector.load %arg7[%c0_13, %c0_14] : memref<64x16xf32, #tpu.memory_space<vmem>>, vector<64x16xf32>
      %cst_15 = arith.constant dense<0.000000e+00> : vector<2x16xf32>
      %26 = tpu.matmul %11, %25, %cst_15 {dimension_numbers = #tpu.dot_dimension_numbers<[1], [0], [0], [1], [0, 0, 1, 1], [], []>} : vector<2x64xf32>, vector<64x16xf32>, vector<2x16xf32> -> vector<2x16xf32>
      %27 = arith.mulf %26, %26 : vector<2x16xf32>
      %cst_16 = arith.constant dense<0.000000e+00> : vector<2xf32>
      %28 = vector.multi_reduction <add>, %27, %cst_16 [1] : vector<2x16xf32> to vector<2xf32>
      %29 = vector.shape_cast %28 : vector<2xf32> to vector<2x1xf32>
      %30 = math.sqrt %29 : vector<2x1xf32>
      %cst_17 = arith.constant 9.99999996E-13 : f32
      %31 = vector.broadcast %cst_17 : f32 to vector<2x1xf32>
      %32 = arith.maximumf %30, %31 : vector<2x1xf32>
      %33 = vector.broadcast %32 : vector<2x1xf32> to vector<2x16xf32>
      %34 = arith.divf %26, %33 : vector<2x16xf32>
      %c0_18 = arith.constant 0 : index
      %c0_19 = arith.constant 0 : index
      %c0_20 = arith.constant 0 : index
      %35 = vector.load %arg17[%c0_18, %c0_19, %c0_20] : memref<1x2x16xf32, #tpu.memory_space<vmem>>, vector<1x2x16xf32>
      %36 = vector.shape_cast %35 : vector<1x2x16xf32> to vector<2x16xf32>
      %37 = vector.shape_cast %34 : vector<2x16xf32> to vector<1x2x16xf32>
      tpu.vector_store %arg17[%c0_18, %c0_19, %c0_20], %37 {strides = array<i32>} : memref<1x2x16xf32, #tpu.memory_space<vmem>>, vector<1x2x16xf32>,
      %cst_21 = arith.constant dense<0.000000e+00> : vector<2x8xf32>
      %38 = vector.multi_reduction <add>, %9, %cst_21 [2] : vector<2x8x64xf32> to vector<2x8xf32>
      %cst_22 = arith.constant 6.400000e+01 : f32
      %39 = vector.broadcast %cst_22 : f32 to vector<2x8xf32>
      %40 = arith.divf %38, %39 : vector<2x8xf32>
      %c0_23 = arith.constant 0 : index
      %c0_24 = arith.constant 0 : index
      %41 = vector.load %arg11[%c0_23, %c0_24] : memref<8x16xf32, #tpu.memory_space<vmem>>, vector<8x16xf32>
      %cst_25 = arith.constant dense<0.000000e+00> : vector<2x16xf32>
      %42 = tpu.matmul %40, %41, %cst_25 {dimension_numbers = #tpu.dot_dimension_numbers<[1], [0], [0], [1], [0, 0, 1, 1], [], []>} : vector<2x8xf32>, vector<8x16xf32>, vector<2x16xf32> -> vector<2x16xf32>
      %c0_26 = arith.constant 0 : index
      %c0_27 = arith.constant 0 : index
      %c0_28 = arith.constant 0 : index
      %43 = vector.load %arg13[%c0_26, %c0_27, %c0_28] : memref<1x1x16xf32, #tpu.memory_space<vmem>>, vector<1x1x16xf32>
      %44 = vector.shape_cast %43 : vector<1x1x16xf32> to vector<1x16xf32>
      %45 = vector.broadcast %44 : vector<1x16xf32> to vector<2x16xf32>
      %46 = arith.addf %42, %45 : vector<2x16xf32>
      %cst_29 = arith.constant dense<0.000000e+00> : vector<16xf32>
      %47 = vector.multi_reduction <add>, %46, %cst_29 [0] : vector<2x16xf32> to vector<16xf32>
      %48 = vector.shape_cast %47 : vector<16xf32> to vector<1x16xf32>
      %cst_30 = arith.constant 2.000000e+00 : f32
      %49 = vector.broadcast %cst_30 : f32 to vector<1x16xf32>
      %50 = arith.divf %48, %49 : vector<1x16xf32>
      %51 = vector.broadcast %50 : vector<1x16xf32> to vector<2x16xf32>
      %52 = arith.subf %46, %51 : vector<2x16xf32>
      %53 = arith.mulf %52, %52 : vector<2x16xf32>
      %cst_31 = arith.constant dense<0.000000e+00> : vector<16xf32>
      %54 = vector.multi_reduction <add>, %53, %cst_31 [0] : vector<2x16xf32> to vector<16xf32>
      %55 = vector.shape_cast %54 : vector<16xf32> to vector<1x16xf32>
      %cst_32 = arith.constant 2.000000e+00 : f32
      %56 = vector.broadcast %cst_32 : f32 to vector<1x16xf32>
      %57 = arith.divf %55, %56 : vector<1x16xf32>
      %58 = vector.broadcast %50 : vector<1x16xf32> to vector<2x16xf32>
      %59 = arith.subf %46, %58 : vector<2x16xf32>
      %cst_33 = arith.constant 9.99999974E-6 : f32
      %60 = vector.broadcast %cst_33 : f32 to vector<1x16xf32>
      %61 = arith.addf %57, %60 : vector<1x16xf32>
      %62 = math.sqrt %61 : vector<1x16xf32>
      %63 = vector.broadcast %62 : vector<1x16xf32> to vector<2x16xf32>
      %64 = arith.divf %59, %63 : vector<2x16xf32>
      %c0_34 = arith.constant 0 : index
      %c0_35 = arith.constant 0 : index
      %c0_36 = arith.constant 0 : index
      %65 = vector.load %arg14[%c0_34, %c0_35, %c0_36] : memref<1x1x16xf32, #tpu.memory_space<vmem>>, vector<1x1x16xf32>
      %66 = vector.shape_cast %65 : vector<1x1x16xf32> to vector<1x16xf32>
      %67 = vector.broadcast %66 : vector<1x16xf32> to vector<2x16xf32>
      %68 = arith.mulf %64, %67 : vector<2x16xf32>
      %c0_37 = arith.constant 0 : index
      %c0_38 = arith.constant 0 : index
      %c0_39 = arith.constant 0 : index
      %69 = vector.load %arg15[%c0_37, %c0_38, %c0_39] : memref<1x1x16xf32, #tpu.memory_space<vmem>>, vector<1x1x16xf32>
      %70 = vector.shape_cast %69 : vector<1x1x16xf32> to vector<1x16xf32>
      %71 = vector.broadcast %70 : vector<1x16xf32> to vector<2x16xf32>
      %72 = arith.addf %68, %71 : vector<2x16xf32>
      %cst_40 = arith.constant 0.000000e+00 : f32
      %73 = vector.broadcast %cst_40 : f32 to vector<2x16xf32>
      %74 = arith.maximumf %72, %73 : vector<2x16xf32>
      %c0_41 = arith.constant 0 : index
      %c0_42 = arith.constant 0 : index
      %c0_43 = arith.constant 0 : index
      %75 = vector.load %arg18[%c0_41, %c0_42, %c0_43] : memref<1x2x16xf32, #tpu.memory_space<vmem>>, vector<1x2x16xf32>
      %76 = vector.shape_cast %75 : vector<1x2x16xf32> to vector<2x16xf32>
      %77 = vector.shape_cast %74 : vector<2x16xf32> to vector<1x2x16xf32>
      tpu.vector_store %arg18[%c0_41, %c0_42, %c0_43], %77 {strides = array<i32>} : memref<1x2x16xf32, #tpu.memory_space<vmem>>, vector<1x2x16xf32>,
    } else {
    }
    %c2_i32 = arith.constant 2 : i32
    %6 = arith.cmpi eq, %arg0, %c2_i32 : i32
    %7 = arith.extui %6 : i1 to i32
    %c0_i32_2 = arith.constant 0 : i32
    %8 = arith.cmpi ne, %7, %c0_i32_2 : i32
    scf.if %8 {
      %c0 = arith.constant 0 : index
      %c0_3 = arith.constant 0 : index
      %c0_4 = arith.constant 0 : index
      %9 = vector.load %arg3[%c0, %c0_3, %c0_4] : memref<2x16x16xf32, #tpu.memory_space<vmem>>, vector<2x16x16xf32>
      %10 = arith.mulf %9, %9 : vector<2x16x16xf32>
      %cst = arith.constant dense<0.000000e+00> : vector<2x16xf32>
      %11 = vector.multi_reduction <add>, %10, %cst [1] : vector<2x16x16xf32> to vector<2x16xf32>
      %c0_5 = arith.constant 0 : index
      %c0_6 = arith.constant 0 : index
      %12 = vector.load %arg8[%c0_5, %c0_6] : memref<16x64xf32, #tpu.memory_space<vmem>>, vector<16x64xf32>
      %cst_7 = arith.constant dense<0.000000e+00> : vector<2x64xf32>
      %13 = tpu.matmul %11, %12, %cst_7 {dimension_numbers = #tpu.dot_dimension_numbers<[1], [0], [0], [1], [0, 0, 1, 1], [], []>} : vector<2x16xf32>, vector<16x64xf32>, vector<2x64xf32> -> vector<2x64xf32>
      %14 = arith.mulf %13, %13 : vector<2x64xf32>
      %cst_8 = arith.constant dense<0.000000e+00> : vector<2xf32>
      %15 = vector.multi_reduction <add>, %14, %cst_8 [1] : vector<2x64xf32> to vector<2xf32>
      %16 = vector.shape_cast %15 : vector<2xf32> to vector<2x1xf32>
      %17 = math.sqrt %16 : vector<2x1xf32>
      %cst_9 = arith.constant 9.99999996E-13 : f32
      %18 = vector.broadcast %cst_9 : f32 to vector<2x1xf32>
      %19 = arith.maximumf %17, %18 : vector<2x1xf32>
      %20 = vector.broadcast %19 : vector<2x1xf32> to vector<2x64xf32>
      %21 = arith.divf %13, %20 : vector<2x64xf32>
      %c0_10 = arith.constant 0 : index
      %c0_11 = arith.constant 0 : index
      %c0_12 = arith.constant 0 : index
      %22 = vector.load %arg16[%c0_10, %c0_11, %c0_12] : memref<1x2x64xf32, #tpu.memory_space<vmem>>, vector<1x2x64xf32>
      %23 = vector.shape_cast %22 : vector<1x2x64xf32> to vector<2x64xf32>
      %24 = vector.shape_cast %21 : vector<2x64xf32> to vector<1x2x64xf32>
      tpu.vector_store %arg16[%c0_10, %c0_11, %c0_12], %24 {strides = array<i32>} : memref<1x2x64xf32, #tpu.memory_space<vmem>>, vector<1x2x64xf32>,
      %c0_13 = arith.constant 0 : index
      %c0_14 = arith.constant 0 : index
      %25 = vector.load %arg9[%c0_13, %c0_14] : memref<16x16xf32, #tpu.memory_space<vmem>>, vector<16x16xf32>
      %cst_15 = arith.constant dense<0.000000e+00> : vector<2x16xf32>
      %26 = tpu.matmul %11, %25, %cst_15 {dimension_numbers = #tpu.dot_dimension_numbers<[1], [0], [0], [1], [0, 0, 1, 1], [], []>} : vector<2x16xf32>, vector<16x16xf32>, vector<2x16xf32> -> vector<2x16xf32>
      %27 = arith.mulf %26, %26 : vector<2x16xf32>
      %cst_16 = arith.constant dense<0.000000e+00> : vector<2xf32>
      %28 = vector.multi_reduction <add>, %27, %cst_16 [1] : vector<2x16xf32> to vector<2xf32>
      %29 = vector.shape_cast %28 : vector<2xf32> to vector<2x1xf32>
      %30 = math.sqrt %29 : vector<2x1xf32>
      %cst_17 = arith.constant 9.99999996E-13 : f32
      %31 = vector.broadcast %cst_17 : f32 to vector<2x1xf32>
      %32 = arith.maximumf %30, %31 : vector<2x1xf32>
      %33 = vector.broadcast %32 : vector<2x1xf32> to vector<2x16xf32>
      %34 = arith.divf %26, %33 : vector<2x16xf32>
      %c0_18 = arith.constant 0 : index
      %c0_19 = arith.constant 0 : index
      %c0_20 = arith.constant 0 : index
      %35 = vector.load %arg17[%c0_18, %c0_19, %c0_20] : memref<1x2x16xf32, #tpu.memory_space<vmem>>, vector<1x2x16xf32>
      %36 = vector.shape_cast %35 : vector<1x2x16xf32> to vector<2x16xf32>
      %37 = vector.shape_cast %34 : vector<2x16xf32> to vector<1x2x16xf32>
      tpu.vector_store %arg17[%c0_18, %c0_19, %c0_20], %37 {strides = array<i32>} : memref<1x2x16xf32, #tpu.memory_space<vmem>>, vector<1x2x16xf32>,
      %cst_21 = arith.constant dense<0.000000e+00> : vector<2x16xf32>
      %38 = vector.multi_reduction <add>, %9, %cst_21 [2] : vector<2x16x16xf32> to vector<2x16xf32>
      %cst_22 = arith.constant 1.600000e+01 : f32
      %39 = vector.broadcast %cst_22 : f32 to vector<2x16xf32>
      %40 = arith.divf %38, %39 : vector<2x16xf32>
      %c0_23 = arith.constant 0 : index
      %c0_24 = arith.constant 0 : index
      %41 = vector.load %arg12[%c0_23, %c0_24] : memref<16x16xf32, #tpu.memory_space<vmem>>, vector<16x16xf32>
      %cst_25 = arith.constant dense<0.000000e+00> : vector<2x16xf32>
      %42 = tpu.matmul %40, %41, %cst_25 {dimension_numbers = #tpu.dot_dimension_numbers<[1], [0], [0], [1], [0, 0, 1, 1], [], []>} : vector<2x16xf32>, vector<16x16xf32>, vector<2x16xf32> -> vector<2x16xf32>
      %c0_26 = arith.constant 0 : index
      %c0_27 = arith.constant 0 : index
      %c0_28 = arith.constant 0 : index
      %43 = vector.load %arg13[%c0_26, %c0_27, %c0_28] : memref<1x1x16xf32, #tpu.memory_space<vmem>>, vector<1x1x16xf32>
      %44 = vector.shape_cast %43 : vector<1x1x16xf32> to vector<1x16xf32>
      %45 = vector.broadcast %44 : vector<1x16xf32> to vector<2x16xf32>
      %46 = arith.addf %42, %45 : vector<2x16xf32>
      %cst_29 = arith.constant dense<0.000000e+00> : vector<16xf32>
      %47 = vector.multi_reduction <add>, %46, %cst_29 [0] : vector<2x16xf32> to vector<16xf32>
      %48 = vector.shape_cast %47 : vector<16xf32> to vector<1x16xf32>
      %cst_30 = arith.constant 2.000000e+00 : f32
      %49 = vector.broadcast %cst_30 : f32 to vector<1x16xf32>
      %50 = arith.divf %48, %49 : vector<1x16xf32>
      %51 = vector.broadcast %50 : vector<1x16xf32> to vector<2x16xf32>
      %52 = arith.subf %46, %51 : vector<2x16xf32>
      %53 = arith.mulf %52, %52 : vector<2x16xf32>
      %cst_31 = arith.constant dense<0.000000e+00> : vector<16xf32>
      %54 = vector.multi_reduction <add>, %53, %cst_31 [0] : vector<2x16xf32> to vector<16xf32>
      %55 = vector.shape_cast %54 : vector<16xf32> to vector<1x16xf32>
      %cst_32 = arith.constant 2.000000e+00 : f32
      %56 = vector.broadcast %cst_32 : f32 to vector<1x16xf32>
      %57 = arith.divf %55, %56 : vector<1x16xf32>
      %58 = vector.broadcast %50 : vector<1x16xf32> to vector<2x16xf32>
      %59 = arith.subf %46, %58 : vector<2x16xf32>
      %cst_33 = arith.constant 9.99999974E-6 : f32
      %60 = vector.broadcast %cst_33 : f32 to vector<1x16xf32>
      %61 = arith.addf %57, %60 : vector<1x16xf32>
      %62 = math.sqrt %61 : vector<1x16xf32>
      %63 = vector.broadcast %62 : vector<1x16xf32> to vector<2x16xf32>
      %64 = arith.divf %59, %63 : vector<2x16xf32>
      %c0_34 = arith.constant 0 : index
      %c0_35 = arith.constant 0 : index
      %c0_36 = arith.constant 0 : index
      %65 = vector.load %arg14[%c0_34, %c0_35, %c0_36] : memref<1x1x16xf32, #tpu.memory_space<vmem>>, vector<1x1x16xf32>
      %66 = vector.shape_cast %65 : vector<1x1x16xf32> to vector<1x16xf32>
      %67 = vector.broadcast %66 : vector<1x16xf32> to vector<2x16xf32>
      %68 = arith.mulf %64, %67 : vector<2x16xf32>
      %c0_37 = arith.constant 0 : index
      %c0_38 = arith.constant 0 : index
      %c0_39 = arith.constant 0 : index
      %69 = vector.load %arg15[%c0_37, %c0_38, %c0_39] : memref<1x1x16xf32, #tpu.memory_space<vmem>>, vector<1x1x16xf32>
      %70 = vector.shape_cast %69 : vector<1x1x16xf32> to vector<1x16xf32>
      %71 = vector.broadcast %70 : vector<1x16xf32> to vector<2x16xf32>
      %72 = arith.addf %68, %71 : vector<2x16xf32>
      %cst_40 = arith.constant 0.000000e+00 : f32
      %73 = vector.broadcast %cst_40 : f32 to vector<2x16xf32>
      %74 = arith.maximumf %72, %73 : vector<2x16xf32>
      %c0_41 = arith.constant 0 : index
      %c0_42 = arith.constant 0 : index
      %c0_43 = arith.constant 0 : index
      %75 = vector.load %arg18[%c0_41, %c0_42, %c0_43] : memref<1x2x16xf32, #tpu.memory_space<vmem>>, vector<1x2x16xf32>
      %76 = vector.shape_cast %75 : vector<1x2x16xf32> to vector<2x16xf32>
      %77 = vector.shape_cast %74 : vector<2x16xf32> to vector<1x2x16xf32>
      tpu.vector_store %arg18[%c0_41, %c0_42, %c0_43], %77 {strides = array<i32>} : memref<1x2x16xf32, #tpu.memory_space<vmem>>, vector<1x2x16xf32>,
    } else {
    }
    return
  }
  func.func @transform_0(%arg0: i32) -> (i32, i32, i32) {
    %c0_i32 = arith.constant 0 : i32
    %c0_i32_0 = arith.constant 0 : i32
    %c0_i32_1 = arith.constant 0 : i32
    %c0_i32_2 = arith.constant 0 : i32
    return %c0_i32, %c0_i32_0, %c0_i32_1 : i32, i32, i32
  }
  func.func @transform_1(%arg0: i32) -> (i32, i32, i32) {
    %c0_i32 = arith.constant 0 : i32
    %c0_i32_0 = arith.constant 0 : i32
    %c0_i32_1 = arith.constant 0 : i32
    %c0_i32_2 = arith.constant 0 : i32
    return %c0_i32, %c0_i32_0, %c0_i32_1 : i32, i32, i32
  }
  func.func @transform_2(%arg0: i32) -> (i32, i32, i32) {
    %c0_i32 = arith.constant 0 : i32
    %c0_i32_0 = arith.constant 0 : i32
    %c0_i32_1 = arith.constant 0 : i32
    %c0_i32_2 = arith.constant 0 : i32
    return %c0_i32, %c0_i32_0, %c0_i32_1 : i32, i32, i32
  }
  func.func @transform_3(%arg0: i32) -> (i32, i32) {
    %c0_i32 = arith.constant 0 : i32
    %c0_i32_0 = arith.constant 0 : i32
    %c0_i32_1 = arith.constant 0 : i32
    return %c0_i32, %c0_i32_0 : i32, i32
  }
  func.func @transform_4(%arg0: i32) -> (i32, i32) {
    %c0_i32 = arith.constant 0 : i32
    %c0_i32_0 = arith.constant 0 : i32
    %c0_i32_1 = arith.constant 0 : i32
    return %c0_i32, %c0_i32_0 : i32, i32
  }
  func.func @transform_5(%arg0: i32) -> (i32, i32) {
    %c0_i32 = arith.constant 0 : i32
    %c0_i32_0 = arith.constant 0 : i32
    %c0_i32_1 = arith.constant 0 : i32
    return %c0_i32, %c0_i32_0 : i32, i32
  }
  func.func @transform_6(%arg0: i32) -> (i32, i32) {
    %c0_i32 = arith.constant 0 : i32
    %c0_i32_0 = arith.constant 0 : i32
    %c0_i32_1 = arith.constant 0 : i32
    return %c0_i32, %c0_i32_0 : i32, i32
  }
  func.func @transform_7(%arg0: i32) -> (i32, i32) {
    %c0_i32 = arith.constant 0 : i32
    %c0_i32_0 = arith.constant 0 : i32
    %c0_i32_1 = arith.constant 0 : i32
    return %c0_i32, %c0_i32_0 : i32, i32
  }
  func.func @transform_8(%arg0: i32) -> (i32, i32) {
    %c0_i32 = arith.constant 0 : i32
    %c0_i32_0 = arith.constant 0 : i32
    %c0_i32_1 = arith.constant 0 : i32
    return %c0_i32, %c0_i32_0 : i32, i32
  }
  func.func @transform_9(%arg0: i32) -> (i32, i32) {
    %c0_i32 = arith.constant 0 : i32
    %c0_i32_0 = arith.constant 0 : i32
    %c0_i32_1 = arith.constant 0 : i32
    return %c0_i32, %c0_i32_0 : i32, i32
  }
  func.func @transform_10(%arg0: i32) -> (i32, i32) {
    %c0_i32 = arith.constant 0 : i32
    %c0_i32_0 = arith.constant 0 : i32
    %c0_i32_1 = arith.constant 0 : i32
    return %c0_i32, %c0_i32_0 : i32, i32
  }
  func.func @transform_11(%arg0: i32) -> (i32, i32) {
    %c0_i32 = arith.constant 0 : i32
    %c0_i32_0 = arith.constant 0 : i32
    %c0_i32_1 = arith.constant 0 : i32
    return %c0_i32, %c0_i32_0 : i32, i32
  }
  func.func @transform_12(%arg0: i32) -> (i32, i32, i32) {
    %c0_i32 = arith.constant 0 : i32
    %c0_i32_0 = arith.constant 0 : i32
    %c0_i32_1 = arith.constant 0 : i32
    return %arg0, %c0_i32, %c0_i32_0 : i32, i32, i32
  }
  func.func @transform_13(%arg0: i32) -> (i32, i32, i32) {
    %c0_i32 = arith.constant 0 : i32
    %c0_i32_0 = arith.constant 0 : i32
    %c0_i32_1 = arith.constant 0 : i32
    return %arg0, %c0_i32, %c0_i32_0 : i32, i32, i32
  }
  func.func @transform_14(%arg0: i32) -> (i32, i32, i32) {
    %c0_i32 = arith.constant 0 : i32
    %c0_i32_0 = arith.constant 0 : i32
    %c0_i32_1 = arith.constant 0 : i32
    return %arg0, %c0_i32, %c0_i32_0 : i32, i32, i32
  }
  func.func @transform_15(%arg0: i32) -> (i32, i32, i32) {
    %c0_i32 = arith.constant 0 : i32
    %c0_i32_0 = arith.constant 0 : i32
    %c0_i32_1 = arith.constant 0 : i32
    return %arg0, %c0_i32, %c0_i32_0 : i32, i32, i32
  }
  func.func @transform_16(%arg0: i32) -> (i32, i32, i32) {
    %c0_i32 = arith.constant 0 : i32
    %c0_i32_0 = arith.constant 0 : i32
    %c0_i32_1 = arith.constant 0 : i32
    return %arg0, %c0_i32, %c0_i32_0 : i32, i32, i32
  }
  func.func @transform_17(%arg0: i32) -> (i32, i32, i32) {
    %c0_i32 = arith.constant 0 : i32
    %c0_i32_0 = arith.constant 0 : i32
    %c0_i32_1 = arith.constant 0 : i32
    return %arg0, %c0_i32, %c0_i32_0 : i32, i32, i32
  }
}

</mosaic_0001>

<bundles_post_ra>
// kernel: tpu_custom_call.1
= control target key start
LH: loop header
LB: loop body
LE: loop exit
PB: predicated region body
PF: predicated region fallthrough
CT: control target
= control target key end

     0   :  { %s3167_s0 = inlined_call_operand.vmem [shape: f32[2,4,256], index: 0, kind: input, shape index: {}]   ;;  %s3168_s1 = inlined_call_operand.vmem [shape: f32[2,8,64], index: 1, kind: input, shape index: {}]   ;;  %s3169_s2 = inlined_call_operand.vmem [shape: f32[2,16,16], index: 2, kind: input, shape index: {}]   ;;  %s3170_s3 = inlined_call_operand.vmem [shape: f32[256,64], index: 3, kind: input, shape index: {}]   ;;  %s3171_s4 = inlined_call_operand.vmem [shape: f32[256,16], index: 4, kind: input, shape index: {}]   ;;  %s3172_s5 = inlined_call_operand.vmem [shape: f32[64,64], index: 5, kind: input, shape index: {}]   ;;  %s3173_s6 = inlined_call_operand.vmem [shape: f32[64,16], index: 6, kind: input, shape index: {}]   ;;  %s3174_s7 = inlined_call_operand.vmem [shape: f32[16,64], index: 7, kind: input, shape index: {}]   ;;  %s3175_s8 = inlined_call_operand.vmem [shape: f32[16,16], index: 8, kind: input, shape index: {}]   ;;  %s3176_s9 = inlined_call_operand.vmem [shape: f32[4,16], index: 9, kind: input, shape index: {}]   ;;  %s3177_s10 = inlined_call_operand.vmem [shape: f32[8,16], index: 10, kind: input, shape index: {}]   ;;  %s3178_s11 = inlined_call_operand.vmem [shape: f32[16,16], index: 11, kind: input, shape index: {}]   ;;  %s3179_s12 = inlined_call_operand.vmem [shape: f32[3,1,16], index: 12, kind: input, shape index: {}]   ;;  %s3180_s13 = inlined_call_operand.vmem [shape: f32[3,1,16], index: 13, kind: input, shape index: {}]   ;;  %s3181_s14 = inlined_call_operand.vmem [shape: f32[3,1,16], index: 14, kind: input, shape index: {}]   ;;  %s3182_s15 = inlined_call_operand.hbm [shape: f32[3,2,64], index: 15, kind: output, shape index: {0}]   ;;  %s3183_s16 = inlined_call_operand.hbm [shape: f32[3,2,16], index: 16, kind: output, shape index: {1}]   ;;  %s3184_s17 = inlined_call_operand.hbm [shape: f32[3,2,16], index: 17, kind: output, shape index: {2}]  }
   0x1   :  { %3199 = sst [smem:[#allocation16_spill]] %s3167_s0 }
   0x2   :  { %3200 = sst [smem:[#allocation17_spill]] %s3168_s1 }
   0x3   :  { %3201 = sst [smem:[#allocation18_spill]] %s3179_s12 }
   0x4   :  { %3202 = sst [smem:[#allocation19_spill]] %s3180_s13 }
   0x5   :  { %3203 = sst [smem:[#allocation20_spill]] %s3181_s14 }
   0x6   :  { %3204 = sst [smem:[#allocation21_spill]] %s3184_s17 }
   0x7   :  { %23 = vsyncpa [#allocation3], 0 }
   0x8   :  { %25 = vsyncpa [#allocation3 + $0x1], 0 }
   0x9   :  { %26 = vsyncpa [#allocation5], 0 }
   0xa   :  { %28 = vsyncpa [#allocation5 + $0x1], 0  ;;  %s2597_s24 = smov 0   ;;  %s2599_s25 = smov 0  }
   0xb   :  { %s2601_s26 = smov 0   ;;  %s2603_s27 = smov 0  }
   0xc LB: > { %3205 = sst [smem:[#allocation9_spill]] %s2482_s24  ;;  %s2618_s28 = sadd.s32 4294967295, %s2494_s27   ;;  %s2494_s27 = sphi %s2603_s27, %s3226_s27   ;;  %s2490_s26 = sphi %s2601_s26, %s3229_s26   ;;  %s2486_s25 = sphi %s2599_s25, %s3228_s25   ;;  %s2482_s24 = sphi %s2597_s24, %s3227_s24  }
   0xd   : > { %3206 = sst [smem:[#allocation10_spill]] %s2486_s25  ;;  %s3187_s29 = sadd.s32 4294967294, %s2494_s27  }
   0xe   : > { %3207 = sst [smem:[#allocation11_spill]] %s2490_s26  ;;  %s2622_s0 = sadd.s32 1, %s2494_s27  }
   0xf   : > { %3208 = sst [smem:[#allocation12_spill]] %s2494_s27  ;;  %s371_s30 = sadd.s32 1, %s2490_s26 }
  0x10   : > { %3209 = sst [smem:[#allocation13_spill]] %s2622_s0  ;;  %s368_s18 = ssub.s32 %s2494_s27, %s2622_s0 }
  0x11   : > { %p381_p0 = scmp.ne.s32.totalorder %s2490_s26, %s2486_s25  ;;  %p369_p1 = scmp.eq.s32.totalorder %s368_s18, 0 }
  0x12   : > { %p382_p2 = scmp.eq.s32.totalorder %s2618_s28, 2  ;;  %p387_p3 = scmp.ne.s32.totalorder %s2486_s25, %s2482_s24 }
  0x13   : > { %p388_p4 = scmp.eq.s32.totalorder %s3187_s29, 2  ;;  %p1978_p7 = scmp.ge.s32.totalorder %s2494_s27, 1 }
  0x14   : > { %s2635_s19 = scalar_select %p369_p1, %s2490_s26, %s371_s30  }
  0x15   : > { %p2637_p5 = por %p382_p2, %p381_p0  ;;  %p2641_p6 = por %p388_p4, %p387_p3 }
  0x16   : > { %3210 = sst [smem:[#allocation14_spill]] %s2635_s19  ;;  %p512_p8 = scmp.lt.s32.totalorder %s2494_s27, 4 }
  0x17   : > { %s3212_s20 = scalar_select %p2641_p6, 1, 0 }
  0x18   : > { %p513_p9 = pnand %p1978_p7, %p512_p8 }
  0x19   : > { %3213 = sst [smem:[#allocation15_spill]] %s3212_s20  ;;  %s3197_s21 = sand.u32 (!%p513_p9), 1, %s2486_s25  }
  0x1a   : > { %516 = sbr.rel (%p513_p9) target bundleno = 1442 (0x5a2), region = 80  ;;  %p578_p10 = scmp.lt.s32.totalorder (!%p513_p9), %s2618_s28, 2 }
  0x1b   : > { %s1979_s22 = sshll.u32 (!%p513_p9), %s3197_s21, 1  ;;  %s3214_s12 = sld [smem:[#allocation18_spill]] (!%p513_p9) }
  0x1c   : > { %s3215_s13 = sld [smem:[#allocation19_spill]] (!%p513_p9)  ;;  %s3216_s14 = sld [smem:[#allocation20_spill]] (!%p513_p9) }
  0x1d   : > { %s2667_s17 = scalar_lea.vmem (!%p513_p9), [#allocation2], %s1979_s22  ;;  %s2669_s25 = scalar_lea.vmem (!%p513_p9), [#allocation4], %s1979_s22 }
  0x1e   : > { %s2671_s21 = scalar_lea.vmem (!%p513_p9), [#allocation6], %s1979_s22  ;;  %p1982_p11 = scmp.ne.s32.totalorder (!%p513_p9), %s2618_s28, 0 }
  0x21   : > { %s579_s23 = scalar_select %p578_p10, %s2618_s28, 2 }
  0x22   : > { %590 = sbr.rel (%p1982_p11) target bundleno = 484 (0x1e4), region = 84  ;;  %v646_v0 = vld [vmem:[%s3170_s3 + $0x80] sm:$0xff] (!%p1982_p11)  ;;  %v647_v1 = vld [vmem:[%s3170_s3 + $0x88] sm:$0xff] (!%p1982_p11)  ;;  %vm601_vm0 = vcmask (!%p1982_p11), 1043456   ;;  %v648_v6 = vld [vmem:[%s3170_s3 + $0x90] sm:$0xff] (!%p1982_p11)  ;;  %vm666_vm1 = vcmask (!%p1982_p11), 1041409  }
  0x23   : > { %s2655_s29 = scalar_lea.vmem %s3214_s12, %s579_s23  ;;  %s2660_s0 = scalar_lea.vmem %s3215_s13, %s579_s23  ;;  %v630_v2 = vld [vmem:[%s3170_s3] sm:$0xff] (!%p1982_p11)  ;;  %v2180_v3 = vpack.c.bf16 (!%p1982_p11), %v647_v1, %v646_v0  ;;  %v631_v4 = vld [vmem:[%s3170_s3 + $0x8] sm:$0xff] (!%p1982_p11)  ;;  %v649_v11 = vld [vmem:[%s3170_s3 + $0x98] sm:$0xff] (!%p1982_p11)  ;;  %vm2497_vm2 = vmmov (!%p1982_p11), 0   ;;  %vm915_vm3 = vcmask (!%p1982_p11), 31744   ;;  %vm742_vm4 = vcmask (!%p1982_p11), 517120  }
  0x24   : > { %s2665_s27 = scalar_lea.vmem %s3216_s14, %s579_s23  ;;  %s3217_s14 = sld [smem:[#allocation16_spill]] (!%p1982_p11)  ;;  %v2182_v7 = vpack.c.bf16 (!%p1982_p11), %v631_v4, %v630_v2  ;;  %v773_v12 = vld [vmem:[%s3171_s4 + $0x80] sm:$0xff] (!%p1982_p11)  ;;  %v774_v13 = vld [vmem:[%s3171_s4 + $0x88] sm:$0xff] (!%p1982_p11)  ;;  %v2184_v14 = vpack.c.bf16 (!%p1982_p11), %v649_v11, %v648_v6  ;;  %v632_v16 = vld [vmem:[%s3170_s3 + $0x10] sm:$0xff] (!%p1982_p11)  ;;  %vm860_vm5 = vcmask (!%p1982_p11), 123904  }
  0x25   : > { %2181 = vmatprep.subr.bf16.mxu0 (!%p1982_p11), %v2180_v3  ;;  %v2212_v15 = vpack.c.bf16 (!%p1982_p11), %v774_v13, %v773_v12  ;;  %v633_v17 = vld [vmem:[%s3170_s3 + $0x18] sm:$0xff] (!%p1982_p11)  ;;  %v757_v18 = vld [vmem:[%s3171_s4] sm:$0xff] (!%p1982_p11)  ;;  %v758_v23 = vld [vmem:[%s3171_s4 + $0x8] sm:$0xff] (!%p1982_p11) }
  0x26   : > { %2183 = vmatpush3.bf16.msra.mxu0 (!%p1982_p11), %v2182_v7  ;;  %v2186_v22 = vpack.c.bf16 (!%p1982_p11), %v633_v17, %v632_v16  ;;  %v650_v25 = vld [vmem:[%s3170_s3 + $0xa0] sm:$0xff] (!%p1982_p11)  ;;  %v2214_v27 = vpack.c.bf16 (!%p1982_p11), %v758_v23, %v757_v18  ;;  %v651_v29 = vld [vmem:[%s3170_s3 + $0xa8] sm:$0xff] (!%p1982_p11)  ;;  %v775_v30 = vld [vmem:[%s3171_s4 + $0x90] sm:$0xff] (!%p1982_p11) }
  0x27   : > { %2185 = vmatprep.subr.bf16.mxu0 (!%p1982_p11), %v2184_v14  ;;  %2213 = vmatprep.subr.bf16.mxu1 (!%p1982_p11), %v2212_v15  ;;  %v776_v31 = vld [vmem:[%s3171_s4 + $0x98] sm:$0xff] (!%p1982_p11)  ;;  %v2188_v35 = vpack.c.bf16 (!%p1982_p11), %v651_v29, %v650_v25  ;;  %v634_v36 = vld [vmem:[%s3170_s3 + $0x20] sm:$0xff] (!%p1982_p11)  ;;  %v635_v37 = vld [vmem:[%s3170_s3 + $0x28] sm:$0xff] (!%p1982_p11) }
  0x28   : > { %v759_v38 = vld [vmem:[%s3171_s4 + $0x10] sm:$0xff] (!%p1982_p11)  ;;  %2215 = vmatpush3.bf16.msra.mxu1 (!%p1982_p11), %v2214_v27  ;;  %v760_v43 = vld [vmem:[%s3171_s4 + $0x18] sm:$0xff] (!%p1982_p11)  ;;  %v2216_v48 = vpack.c.bf16 (!%p1982_p11), %v776_v31, %v775_v30  ;;  %v2190_v49 = vpack.c.bf16 (!%p1982_p11), %v635_v37, %v634_v36  ;;  %v777_v50 = vld [vmem:[%s3171_s4 + $0xa0] sm:$0xff] (!%p1982_p11) }
  0x29   : > { %v652_v44 = vld [vmem:[%s3170_s3 + $0xb0] sm:$0xff]  ;;  %v653_v45 = vld [vmem:[%s3170_s3 + $0xb8] sm:$0xff]  ;;  %v778_v51 = vld [vmem:[%s3171_s4 + $0xa8] sm:$0xff]  ;;  %v2218_v54 = vpack.c.bf16 %v760_v43, %v759_v38 }
  0x2a   : > { %v591_v5 = vld [vmem:[%s3217_s14] sm:$0xff]  ;;  %v592_v24 = vld [vmem:[%s3217_s14 + $0x8] sm:$0xff]  ;;  %2187 = vmatpush3.bf16.msra.mxu0 %v2186_v22  ;;  %v636_v52 = vld [vmem:[%s3170_s3 + $0x30] sm:$0xff]  ;;  %v2192_v55 = vpack.c.bf16 %v653_v45, %v652_v44  ;;  %v2220_v56 = vpack.c.bf16 %v778_v51, %v777_v50  ;;  %2217 = vmatprep.subr.bf16.mxu1 %v2216_v48 }
  0x2b   : > { %v877_v8 = vcombine.high %v591_v5, %v591_v5  ;;  %v881_v9 = vsel %vm601_vm0, %v591_v5, 0.0  ;;  %v593_v10 = vmul.f32 %v591_v5, %v591_v5  ;;  %v594_v28 = vmul.f32 %v592_v24, %v592_v24  ;;  %2189 = vmatprep.subr.bf16.mxu0 %v2188_v35  ;;  %v637_v57 = vld [vmem:[%s3170_s3 + $0x38] sm:$0xff]  ;;  %v761_v58 = vld [vmem:[%s3171_s4 + $0x20] sm:$0xff]  ;;  %v762_v59 = vld [vmem:[%s3171_s4 + $0x28] sm:$0xff] }
  0x2c   : > { %v878_v33 = vcombine.high %v592_v24, %v592_v24  ;;  %v886_v34 = vsel %vm601_vm0, %v592_v24, 0.0  ;;  %v654_v60 = vld [vmem:[%s3170_s3 + $0xc0] sm:$0xff]  ;;  %v655_v61 = vld [vmem:[%s3170_s3 + $0xc8] sm:$0xff]  ;;  %v779_v62 = vld [vmem:[%s3171_s4 + $0xb0] sm:$0xff]  ;;  %2219 = vmatpush3.bf16.msra.mxu1 %v2218_v54  ;;  %v2222_v2 = vpack.c.bf16 %v762_v59, %v761_v58  ;;  %v2194_v6 = vpack.c.bf16 %v637_v57, %v636_v52 }
  0x2d   : > { %v882_v19 = vsel %vm601_vm0, %v877_v8, 0.0  ;;  %v597_v20 = vcombine.high %v593_v10, %v593_v10  ;;  %v602_v21 = vsel %vm601_vm0, %v593_v10, 0.0  ;;  %v598_v41 = vcombine.high %v594_v28, %v594_v28  ;;  %v780_v3 = vld [vmem:[%s3171_s4 + $0xb8] sm:$0xff]  ;;  %v638_v4 = vld [vmem:[%s3170_s3 + $0x40] sm:$0xff]  ;;  %2221 = vmatprep.subr.bf16.mxu1 %v2220_v56  ;;  %v639_v8 = vld [vmem:[%s3170_s3 + $0x48] sm:$0xff] }
  0x2e   : > { %v883_v26 = vadd.f32 %v882_v19, %v881_v9  ;;  %v603_v39 = vrot.slane %v602_v21, 4  ;;  %v616_v42 = vsel %vm601_vm0, %v594_v28, 0.0  ;;  %v887_v47 = vsel %vm601_vm0, %v878_v33, 0.0  ;;  %2191 = vmatpush3.bf16.msra.mxu0 %v2190_v49  ;;  %v763_v9 = vld [vmem:[%s3171_s4 + $0x30] sm:$0xff]  ;;  %v764_v10 = vld [vmem:[%s3171_s4 + $0x38] sm:$0xff]  ;;  %v781_v14 = vld [vmem:[%s3171_s4 + $0xc0] sm:$0xff] }
  0x2f   : > { %v609_v32 = vsel %vm601_vm0, %v597_v20, 0.0  ;;  %v617_v46 = vrot.slane %v616_v42, 4  ;;  %v888_v53 = vadd.f32 %v887_v47, %v886_v34  ;;  %v623_v5 = vsel %vm601_vm0, %v598_v41, 0.0  ;;  %2193 = vmatprep.subr.bf16.mxu0 %v2192_v55  ;;  %v782_v15 = vld [vmem:[%s3171_s4 + $0xc8] sm:$0xff]  ;;  %v656_v16 = vld [vmem:[%s3170_s3 + $0xd0] sm:$0xff]  ;;  %v657_v17 = vld [vmem:[%s3170_s3 + $0xd8] sm:$0xff] }
  0x30   : > { %884 = vadd.xlane.f32.xlu0 %v883_v26  ;;  %v610_v40 = vrot.slane %v609_v32, 4  ;;  %v604_v0 = vadd.f32 %v603_v39, %v602_v21  ;;  %v2224_v7 = vpack.c.bf16 %v780_v3, %v779_v62  ;;  %v624_v12 = vrot.slane %v623_v5, 4  ;;  %2223 = vmatpush3.bf16.msra.mxu1 %v2222_v2  ;;  %v640_v22 = vld [vmem:[%s3170_s3 + $0x50] sm:$0xff]  ;;  %v641_v25 = vld [vmem:[%s3170_s3 + $0x58] sm:$0xff]  ;;  %v765_v26 = vld [vmem:[%s3171_s4 + $0x40] sm:$0xff] }
  0x31   : > { %v618_v1 = vadd.f32 %v617_v46, %v616_v42  ;;  %v2196_v13 = vpack.c.bf16 %v655_v61, %v654_v60  ;;  %v2198_v20 = vpack.c.bf16 %v639_v8, %v638_v4  ;;  %v2226_v21 = vpack.c.bf16 %v764_v10, %v763_v9  ;;  %v766_v27 = vld [vmem:[%s3171_s4 + $0x48] sm:$0xff]  ;;  %v784_v33 = vld [vmem:[%s3171_s4 + $0xd8] sm:$0xff]  ;;  %v658_v34 = vld [vmem:[%s3170_s3 + $0xe0] sm:$0xff] }
  0x32   : > { %v611_v63 = vadd.f32 %v610_v40, %v609_v32  ;;  %v625_v19 = vadd.f32 %v624_v12, %v623_v5  ;;  %v605_v23 = vrot.slane %v604_v0, 2  ;;  %2195 = vmatpush3.bf16.msra.mxu0 %v2194_v6  ;;  %2225 = vmatprep.subr.bf16.mxu1 %v2224_v7  ;;  %v2228_v24 = vpack.c.bf16 %v782_v15, %v781_v14  ;;  %v783_v32 = vld [vmem:[%s3171_s4 + $0xd0] sm:$0xff]  ;;  %v659_v35 = vld [vmem:[%s3170_s3 + $0xe8] sm:$0xff]  ;;  %v642_v41 = vld [vmem:[%s3170_s3 + $0x60] sm:$0xff] }
  0x33   : > { %v619_v30 = vrot.slane %v618_v1, 2  ;;  %2197 = vmatprep.subr.bf16.mxu0 %v2196_v13  ;;  %v2200_v31 = vpack.c.bf16 %v657_v17, %v656_v16  ;;  %v2202_v37 = vpack.c.bf16 %v641_v25, %v640_v22  ;;  %v2230_v38 = vpack.c.bf16 %v766_v27, %v765_v26  ;;  %v767_v42 = vld [vmem:[%s3171_s4 + $0x50] sm:$0xff]  ;;  %v768_v43 = vld [vmem:[%s3171_s4 + $0x58] sm:$0xff]  ;;  %v643_v48 = vld [vmem:[%s3170_s3 + $0x68] sm:$0xff] }
  0x34   : > { %889 = vadd.xlane.f32.xlu0 %v888_v53  ;;  %v612_v11 = vrot.slane %v611_v63, 2  ;;  %v626_v29 = vrot.slane %v625_v19, 2  ;;  %2227 = vmatpush3.bf16.msra.mxu1 %v2226_v21  ;;  %v606_v39 = vadd.f32 %v605_v23, %v604_v0  ;;  %v2232_v40 = vpack.c.bf16 %v784_v33, %v783_v32  ;;  %v785_v49 = vld [vmem:[%s3171_s4 + $0xe0] sm:$0xff]  ;;  %v786_v50 = vld [vmem:[%s3171_s4 + $0xe8] sm:$0xff]  ;;  %v660_v51 = vld [vmem:[%s3170_s3 + $0xf0] sm:$0xff] }
  0x35   : > { %2229 = vmatprep.subr.bf16.mxu1 %v2228_v24  ;;  %v620_v46 = vadd.f32 %v619_v30, %v618_v1  ;;  %v2204_v47 = vpack.c.bf16 %v659_v35, %v658_v34  ;;  %v661_v52 = vld [vmem:[%s3170_s3 + $0xf8] sm:$0xff]  ;;  %v2234_v54 = vpack.c.bf16 %v768_v43, %v767_v42  ;;  %v2206_v56 = vpack.c.bf16 %v643_v48, %v642_v41  ;;  %v644_v58 = vld [vmem:[%s3170_s3 + $0x70] sm:$0xff]  ;;  %v769_v59 = vld [vmem:[%s3171_s4 + $0x60] sm:$0xff] }
  0x36   : > { %v613_v18 = vadd.f32 %v612_v11, %v611_v63  ;;  %v627_v36 = vadd.f32 %v626_v29, %v625_v19  ;;  %2199 = vmatpush3.bf16.msra.mxu0 %v2198_v20  ;;  %v607_v55 = vrot.slane %v606_v39, 1  ;;  %v2236_v57 = vpack.c.bf16 %v786_v50, %v785_v49  ;;  %v770_v60 = vld [vmem:[%s3171_s4 + $0x68] sm:$0xff]  ;;  %v645_v0 = vld [vmem:[%s3170_s3 + $0x78] sm:$0xff]  ;;  %v787_v1 = vld [vmem:[%s3171_s4 + $0xf0] sm:$0xff] }
  0x37   : > { %2201 = vmatprep.subr.bf16.mxu0 %v2200_v31  ;;  %v621_v62 = vrot.slane %v620_v46, 1  ;;  %v2208_v63 = vpack.c.bf16 %v661_v52, %v660_v51  ;;  %v788_v2 = vld [vmem:[%s3171_s4 + $0xf8] sm:$0xff]  ;;  %v2238_v3 = vpack.c.bf16 %v770_v60, %v769_v59  ;;  %v2210_v5 = vpack.c.bf16 %v645_v0, %v644_v58  ;;  %v771_v8 = vld [vmem:[%s3171_s4 + $0x70] sm:$0xff]  ;;  %v894_v13 = vld [vmem:[%s3176_s9] sm:$0xf] }
  0x38   : > { %v614_v28 = vrot.slane %v613_v18, 1  ;;  %v628_v45 = vrot.slane %v627_v36, 1  ;;  %2231 = vmatpush3.bf16.msra.mxu1 %v2230_v38  ;;  %v608_v4 = vadd.f32 %v607_v55, %v606_v39  ;;  %v2240_v7 = vpack.c.bf16 %v788_v2, %v787_v1  ;;  %v772_v9 = vld [vmem:[%s3171_s4 + $0x78] sm:$0xff]  ;;  %v1983_v35 = vld [vmem:[%s2655_s29] ss:$0 sm:$0xff] }
  0x39   : > { %2233 = vmatprep.subr.bf16.mxu1 %v2232_v40  ;;  %v622_v6 = vadd.f32 %v621_v62, %v620_v46  ;;  %v2242_v10 = vpack.c.bf16 %v772_v9, %v771_v8  ;;  %v2496_v12 = vmov 0.0   ;;  %v904_v14 = vlaneseq }
  0x3a   : > { %v615_v44 = vadd.f32 %v614_v28, %v613_v18  ;;  %v629_v53 = vadd.f32 %v628_v45, %v627_v36  ;;  %2203 = vmatpush3.bf16.msra.mxu0 %v2202_v37 }
  0x3b   : > { %2205 = vmatprep.subr.bf16.mxu0 %v2204_v47  ;;  %v667_v11 = vsel %vm666_vm1, %v622_v6, %v608_v4  ;;  %v905_v15 = vand.u32 127, %v904_v14  ;;  %v907_v16 = vshrl.u32 %v904_v14, 7 }
  0x3c   : > { %v668_v61 = vsel %vm666_vm1, %v629_v53, %v615_v44  ;;  %2235 = vmatpush3.bf16.msra.mxu1 %v2234_v54 }
  0x3d   : > { %735 = vmatprep.mubr.f32.mxu0 %v668_v61  ;;  %853 = vmatprep.mubr.f32.mxu1 %v668_v61  ;;  %v908_v18 = vsub.s32 %v905_v15, %v907_v16 }
  0x3e   : > { %2207 = vmatpush3.bf16.msra.mxu0 %v2206_v56  ;;  %2237 = vmatprep.subr.bf16.mxu1 %v2236_v57 }
  0x3f   : > { %2209 = vmatprep.subr.bf16.mxu0 %v2208_v63 }
  0x40   : > { %2239 = vmatpush3.bf16.msra.mxu1 %v2238_v3 }
  0x41   : > { %2241 = vmatprep.subr.bf16.mxu1 %v2240_v7 }
  0x42   : > { %2211 = vmatpush3.bf16.msra.mxu0 %v2210_v5 }
  0x43   : > { %2111 = vmatprep.subr.mxu0 %v2496_v12 }
  0x44   : > { %2243 = vmatpush3.bf16.msra.mxu1 %v2242_v10 }
  0x45   : > { %736 = vmatmul.mubr.f32.vlgmr.msra.gmra.mrb[0].mxu0 %v667_v11 }
  0x46   : > { %2112 = vmatpush3.msk.msra.mxu0 %vm601_vm0, %v894_v13  ;;  %2113 = vmatprep.mubr.msk.f32.mxu0 %vm2497_vm2, %v2496_v12 }
  0x47   : > { %854 = vmatmul.mubr.f32.vlgmr.msra.gmra.mrb[0].mxu1 %v667_v11 }
  0xbd   : > { %v885_v17 = vpop.xlane.xlu0 %884 }
  0xbe   : > { %v892_v19 = vmul.f32 0.00390625, %v885_v17 }
  0xc0   : > { %v909_v22 = vrot.slane %v892_v19, %v908_v18 }
  0xc1   : > { %v890_v20 = vpop.xlane.xlu0 %889 }
  0xc2   : > { %v893_v21 = vmul.f32 0.00390625, %v890_v20  ;;  %v1987_v20 = vld [vmem:[%s2665_s27] ss:$0 sm:$0xff] }
  0xc4   : > { %v913_v23 = vrot.slane %v893_v21, %v908_v18  ;;  %v1986_v18 = vld [vmem:[%s2660_s0] ss:$0 sm:$0xff] }
  0xc6   : > { %v914_v24 = vsel %vm666_vm1, %v913_v23, %v909_v22 }
  0xc7   : > { %2114 = vmatmul.mubr.msk.f32.vlgmr.msra.gmra.mrb[2].mxu0 %vm915_vm3, %v914_v24 }
 0x118   : > { %v2042_v25 = vpop.f32.mrb[0].mxu0 }
 0x119   : > { %v2043_v26 = vpop.f32.mrb[1].mxu0 }
 0x11a   : > { %v2887_v27 = vadd.f32 %v2043_v26, %v2042_v25  ;;  %v2077_v28 = vpop.f32.mrb[0].mxu1 }
 0x11b   : > { %v2078_v29 = vpop.f32.mrb[1].mxu1 }
 0x11c   : > { %v741_v30 = vmul.f32 %v2887_v27, %v2887_v27  ;;  %v2891_v31 = vadd.f32 %v2078_v29, %v2077_v28 }
 0x11e   : > { %v743_v32 = vsel %vm742_vm4, %v741_v30, 0.0  ;;  %v859_v33 = vmul.f32 %v2891_v31, %v2891_v31 }
 0x11f   : > { %744 = vadd.xlane.f32.xlu1 %v743_v32 }
 0x120   : > { %v861_v34 = vsel %vm860_vm5, %v859_v33, 0.0 }
 0x123   : > { %862 = vadd.xlane.f32.xlu1 %v861_v34 }
 0x19a   : > { %v987_v36 = vpop.f32.mrb[2].mxu0 }
 0x19b   : > { %v988_v37 = vadd.f32 %v1983_v35, %v987_v36  ;;  %v2115_v38 = vpop.f32.mrb[3].mxu0 }
 0x19d   : > { %v991_v39 = vsel %vm860_vm5, %v988_v37, 0.0 }
 0x19e   : > { %v992_v40 = vrot.slane %v991_v39, 4 }
 0x1a0   : > { %v993_v41 = vadd.f32 %v992_v40, %v991_v39 }
 0x1a2   : > { %v994_v42 = vrot.slane %v993_v41, 2 }
 0x1a4   : > { %v995_v43 = vadd.f32 %v994_v42, %v993_v41 }
 0x1a6   : > { %v996_v44 = vrot.slane %v995_v43, 1 }
 0x1a8   : > { %v997_v45 = vadd.f32 %v996_v44, %v995_v43 }
 0x1aa   : > { %v999_v46 = vmul.f32 0.5, %v997_v45 }
 0x1ac   : > { %v1000_v47 = vsub.f32 %v988_v37, %v999_v46  ;;  %v745_v52 = vpop.xlane.xlu1 %744 }
 0x1ad   : > { %2336 = vrsqrt.f32 %v745_v52  ;;  %vm748_vm6 = vcmp.eq.f32.partialorder %v745_v52, inf  ;;  %v751_v62 = vand.u32 2147483648, %v745_v52  ;;  %vm750_vm7 = vcmp.eq.f32.partialorder %v745_v52, 0.0 }
 0x1ae   : > { %v1001_v48 = vmul.f32 %v1000_v47, %v1000_v47 }
 0x1b0   : > { %v1002_v49 = vsel %vm860_vm5, %v1001_v48, 0.0  ;;  %v863_v55 = vpop.xlane.xlu1 %862 }
 0x1b1   : > { %v1003_v50 = vrot.slane %v1002_v49, 4  ;;  %2338 = vrsqrt.f32 %v863_v55  ;;  %vm866_vm8 = vcmp.eq.f32.partialorder %v863_v55, inf  ;;  %v869_v1 = vand.u32 2147483648, %v863_v55 }
 0x1b2   : > { %vm868_vm9 = vcmp.eq.f32.partialorder %v863_v55, 0.0 }
 0x1b3   : > { %v1004_v51 = vadd.f32 %v1003_v50, %v1002_v49 }
 0x1b5   : > { %v1005_v53 = vrot.slane %v1004_v51, 2 }
 0x1b7   : > { %v1006_v54 = vadd.f32 %v1005_v53, %v1004_v51  ;;  %v2337_v59 = vpop.eup %2336 }
 0x1b8   : > { %v747_v61 = vmul.f32 %v2337_v59, %v745_v52 }
 0x1b9   : > { %v1007_v56 = vrot.slane %v1006_v54, 1 }
 0x1ba   : > { %v749_v0 = vsel %vm748_vm6, %v745_v52, %v747_v61 }
 0x1bb   : > { %v1008_v57 = vadd.f32 %v1007_v56, %v1006_v54  ;;  %v2339_v63 = vpop.eup %2338  ;;  %v752_v2 = vsel %vm750_vm7, %v751_v62, %v749_v0 }
 0x1bc   : > { %v865_v3 = vmul.f32 %v2339_v63, %v863_v55  ;;  %v753_v4 = vmax.f32 %v752_v2, 1e-12 }
 0x1bd   : > { %v1009_v58 = vmul.f32 0.5, %v1008_v57 }
 0x1be   : > { %v867_v5 = vsel %vm866_vm8, %v863_v55, %v865_v3 }
 0x1bf   : > { %v1010_v60 = vadd.f32 1e-05, %v1009_v58  ;;  %v870_v6 = vsel %vm868_vm9, %v869_v1, %v867_v5 }
 0x1c0   : > { %v871_v7 = vmax.f32 %v870_v6, 1e-12 }
 0x1c1   : > { %2340 = vrsqrt.f32 %v1010_v60  ;;  %vm1013_vm10 = vcmp.eq.f32.partialorder %v1010_v60, inf  ;;  %v1016_v10 = vand.u32 2147483648, %v1010_v60  ;;  %vm1015_vm11 = vcmp.eq.f32.partialorder %v1010_v60, 0.0 }
 0x1c2   : > { %2342 = vrcp.f32 %v753_v4 }
 0x1c3   : > { %2344 = vrcp.f32 %v871_v7 }
 0x1cb   : > { %v2341_v8 = vpop.eup %2340 }
 0x1cc   : > { %v1012_v9 = vmul.f32 %v2341_v8, %v1010_v60  ;;  %v2343_v13 = vpop.eup %2342 }
 0x1cd   : > { %v755_v14 = vmul.f32 %v2343_v13, %v2887_v27  ;;  %v2345_v15 = vpop.eup %2344 }
 0x1ce   : > { %v1014_v11 = vsel %vm1013_vm10, %v1010_v60, %v1012_v9  ;;  %v873_v16 = vmul.f32 %v2345_v15, %v2891_v31 }
 0x1cf   : > { %v1017_v12 = vsel %vm1015_vm11, %v1016_v10, %v1014_v11  ;;  %756 = vst.msk [vmem:[%s2667_s17] sm:$0x3] %vm742_vm4, %v755_v14 }
 0x1d0   : > { %2346 = vrcp.f32 %v1017_v12  ;;  %874 = vst.msk [vmem:[%s2669_s25] sm:$0x3] %vm860_vm5, %v873_v16 }
 0x1da   : > { %v2347_v17 = vpop.eup %2346 }
 0x1db   : > { %v1019_v19 = vmul.f32 %v2347_v17, %v1000_v47 }
 0x1dd   : > { %v1027_v21 = vmul.f32 %v1986_v18, %v1019_v19 }
 0x1df   : > { %v1035_v22 = vadd.f32 %v1987_v20, %v1027_v21 }
 0x1e1   : > { %v1036_v23 = vmax.f32 %v1035_v22, 0.0 }
 0x1e3   : > { %1037 = vst.msk [vmem:[%s2671_s21] sm:$0x3] %vm860_vm5, %v1036_v23 }
 0x1e4 PF: > { %p1988_p12 = scmp.ne.s32.totalorder %s2618_s28, 1 }
 0x1e5   : > { %s3218_s14 = sld [smem:[#allocation17_spill]] (!%p1988_p12)  ;;  %vm1046_vm12 = vcmask (!%p1988_p12), 523264   ;;  %v1061_v25 = vld [vmem:[%s3172_s5] sm:$0xff] (!%p1988_p12)  ;;  %v1062_v26 = vld [vmem:[%s3172_s5 + $0x8] sm:$0xff] (!%p1988_p12)  ;;  %v2498_v27 = vmov (!%p1988_p12), 0.0|0.0   ;;  %v1063_v32 = vld [vmem:[%s3172_s5 + $0x10] sm:$0xff] (!%p1988_p12)  ;;  %v1274_v8 = vlaneseq (!%p1988_p12) }
 0x1e6   : > { %1041 = sbr.rel (%p1988_p12) target bundleno = 929 (0x3a1), region = 88  ;;  %2244 = vmatprep.subr.bf16.mxu0 (!%p1988_p12), %v2498_v27  ;;  %v2245_v30 = vpack.c.bf16 (!%p1988_p12), %v1062_v26, %v1061_v25  ;;  %2256 = vmatprep.subr.bf16.mxu1 (!%p1988_p12), %v2498_v27  ;;  %v1064_v33 = vld [vmem:[%s3172_s5 + $0x18] sm:$0xff] (!%p1988_p12)  ;;  %v1161_v35 = vld [vmem:[%s3173_s6] sm:$0xff] (!%p1988_p12)  ;;  %v1162_v36 = vld [vmem:[%s3173_s6 + $0x8] sm:$0xff] (!%p1988_p12)  ;;  %vm2499_vm13 = vmmov (!%p1988_p12), 0   ;;  %v2500_v37 = vmov (!%p1988_p12), 0.0  }
 0x1e7   : > { %2132 = vmatprep.mubr.msk.f32.mxu0 (!%p1988_p12), %vm2499_vm13, %v2500_v37  ;;  %v2248_v40 = vpack.c.bf16 (!%p1988_p12), %v1064_v33, %v1063_v32  ;;  %v2257_v41 = vpack.c.bf16 (!%p1988_p12), %v1162_v36, %v1161_v35  ;;  %v1163_v42 = vld [vmem:[%s3173_s6 + $0x10] sm:$0xff] (!%p1988_p12)  ;;  %v1164_v43 = vld [vmem:[%s3173_s6 + $0x18] sm:$0xff] (!%p1988_p12)  ;;  %2151 = vmatprep.mubr.msk.f32.mxu1 (!%p1988_p12), %vm2499_vm13, %v2500_v37  ;;  %v1065_v46 = vld [vmem:[%s3172_s5 + $0x20] sm:$0xff] (!%p1988_p12)  ;;  %vm1071_vm14 = vcmask (!%p1988_p12), 1041409   ;;  %v1275_v9 = vand.u32 (!%p1988_p12), 127, %v1274_v8 }
 0x1e8   : > { %2246 = vmatpush3.bf16.msra.mxu0 (!%p1988_p12), %v2245_v30  ;;  %v1066_v47 = vld [vmem:[%s3172_s5 + $0x28] sm:$0xff] (!%p1988_p12)  ;;  %v2260_v49 = vpack.c.bf16 (!%p1988_p12), %v1164_v43, %v1163_v42  ;;  %v1165_v51 = vld [vmem:[%s3173_s6 + $0x20] sm:$0xff] (!%p1988_p12)  ;;  %v1067_v56 = vld [vmem:[%s3172_s5 + $0x30] sm:$0xff] (!%p1988_p12)  ;;  %v1277_v10 = vshrl.u32 (!%p1988_p12), %v1274_v8, 7  ;;  %vm1285_vm15 = vcmask (!%p1988_p12), 64512   ;;  %vm1146_vm0 = vcmask (!%p1988_p12), 517120  }
 0x1e9   : > { %2247 = vmatprep.subr.bf16.mxu0 (!%p1988_p12), %v2498_v27  ;;  %2258 = vmatpush3.bf16.msra.mxu1 (!%p1988_p12), %v2257_v41  ;;  %v1166_v52 = vld [vmem:[%s3173_s6 + $0x28] sm:$0xff] (!%p1988_p12)  ;;  %v2251_v54 = vpack.c.bf16 (!%p1988_p12), %v1066_v47, %v1065_v46  ;;  %v1068_v57 = vld [vmem:[%s3172_s5 + $0x38] sm:$0xff] (!%p1988_p12)  ;;  %v1167_v61 = vld [vmem:[%s3173_s6 + $0x30] sm:$0xff] (!%p1988_p12)  ;;  %vm1240_vm1 = vcmask (!%p1988_p12), 123904  }
 0x1ea   : > { %2259 = vmatprep.subr.bf16.mxu1 (!%p1988_p12), %v2498_v27  ;;  %v2263_v59 = vpack.c.bf16 (!%p1988_p12), %v1166_v52, %v1165_v51  ;;  %v1168_v62 = vld [vmem:[%s3173_s6 + $0x38] sm:$0xff] (!%p1988_p12)  ;;  %v2254_v0 = vpack.c.bf16 (!%p1988_p12), %v1068_v57, %v1067_v56  ;;  %v1264_v7 = vld [vmem:[%s3177_s10] sm:$0xff] (!%p1988_p12)  ;;  %v1278_v12 = vsub.s32 (!%p1988_p12), %v1275_v9, %v1277_v10 }
 0x1eb   : > { %v1042_v24 = vld [vmem:[%s3218_s14] sm:$0xff] (!%p1988_p12)  ;;  %v1043_v31 = vld [vmem:[%s3218_s14 + $0x8] sm:$0xff] (!%p1988_p12)  ;;  %v2266_v3 = vpack.c.bf16 (!%p1988_p12), %v1168_v62, %v1167_v61 }
 0x1ec   : > { %v1255_v28 = vsel (!%p1988_p12), %vm1046_vm12, %v1042_v24, 0.0  ;;  %v1044_v29 = vmul.f32 (!%p1988_p12), %v1042_v24, %v1042_v24  ;;  %v1045_v34 = vmul.f32 (!%p1988_p12), %v1043_v31, %v1043_v31  ;;  %v1258_v39 = vsel (!%p1988_p12), %vm1046_vm12, %v1043_v31, 0.0  ;;  %2249 = vmatpush3.bf16.msra.mxu0 (!%p1988_p12), %v2248_v40  ;;  %v1993_v10 = vld [vmem:[%s2660_s0] ss:$0 sm:$0xff] (!%p1988_p12) }
 0x1ed   : > { %1256 = vadd.xlane.f32.xlu0 %v1255_v28  ;;  %2250 = vmatprep.subr.bf16.mxu0 %v2498_v27 }
 0x1ee   : > { %v1047_v38 = vsel %vm1046_vm12, %v1044_v29, 0.0  ;;  %v1054_v45 = vsel %vm1046_vm12, %v1045_v34, 0.0  ;;  %2261 = vmatpush3.bf16.msra.mxu1 %v2260_v49 }
 0x1ef   : > { %v1048_v44 = vrot.slane %v1047_v38, 4  ;;  %v1055_v48 = vrot.slane %v1054_v45, 4  ;;  %2262 = vmatprep.subr.bf16.mxu1 %v2498_v27 }
 0x1f0   : > { %2252 = vmatpush3.bf16.msra.mxu0 %v2251_v54 }
 0x1f1   : > { %v1049_v50 = vadd.f32 %v1048_v44, %v1047_v38  ;;  %1259 = vadd.xlane.f32.xlu0 %v1258_v39  ;;  %v1056_v53 = vadd.f32 %v1055_v48, %v1054_v45  ;;  %2253 = vmatprep.subr.bf16.mxu0 %v2498_v27 }
 0x1f2   : > { %2264 = vmatpush3.bf16.msra.mxu1 %v2263_v59 }
 0x1f3   : > { %v1050_v55 = vrot.slane %v1049_v50, 2  ;;  %v1057_v58 = vrot.slane %v1056_v53, 2  ;;  %2265 = vmatprep.subr.bf16.mxu1 %v2498_v27  ;;  %v1991_v27 = vld [vmem:[%s2655_s29] ss:$0 sm:$0xff] }
 0x1f4   : > { %2255 = vmatpush3.bf16.msra.mxu0 %v2254_v0 }
 0x1f5   : > { %v1051_v60 = vadd.f32 %v1050_v55, %v1049_v50  ;;  %v1058_v63 = vadd.f32 %v1057_v58, %v1056_v53  ;;  %2154 = vmatprep.subr.mxu0 %v2500_v37 }
 0x1f6   : > { %2267 = vmatpush3.bf16.msra.mxu1 %v2266_v3 }
 0x1f7   : > { %v1052_v1 = vrot.slane %v1051_v60, 1  ;;  %v1059_v2 = vrot.slane %v1058_v63, 1 }
 0x1f9   : > { %v1053_v4 = vadd.f32 %v1052_v1, %v1051_v60  ;;  %v1060_v5 = vadd.f32 %v1059_v2, %v1058_v63 }
 0x1fb   : > { %v1072_v6 = vsel %vm1071_vm14, %v1060_v5, %v1053_v4 }
 0x1fc   : > { %2133 = vmatmul.mubr.msk.f32.vlgmr.msra.gmra.mrb[0].mxu0 %vm1046_vm12, %v1072_v6  ;;  %2152 = vmatmul.mubr.msk.f32.vlgmr.msra.gmra.mrb[0].mxu1 %vm1046_vm12, %v1072_v6 }
 0x1fd   : > { %2156 = vmatprep.mubr.msk.f32.mxu0 %vm2499_vm13, %v2500_v37  ;;  %2155 = vmatpush3.msra.mxu0 %v1264_v7 }
 0x27a   : > { %v1257_v11 = vpop.xlane.xlu0 %1256 }
 0x27b   : > { %v1262_v13 = vmul.f32 0.015625, %v1257_v11 }
 0x27d   : > { %v1279_v16 = vrot.slane %v1262_v13, %v1278_v12 }
 0x27e   : > { %v1260_v14 = vpop.xlane.xlu0 %1259 }
 0x27f   : > { %v1263_v15 = vmul.f32 0.015625, %v1260_v14 }
 0x281   : > { %v1283_v17 = vrot.slane %v1263_v15, %v1278_v12  ;;  %v1994_v12 = vld [vmem:[%s2665_s27] ss:$0 sm:$0xff] }
 0x283   : > { %v1284_v18 = vsel %vm1071_vm14, %v1283_v17, %v1279_v16 }
 0x284   : > { %2157 = vmatmul.mubr.msk.f32.vlgmr.msra.gmra.mrb[2].mxu0 %vm1285_vm15, %v1284_v18 }
 0x2cf   : > { %v1141_v19 = vpop.f32.mrb[0].mxu0  ;;  %v1235_v22 = vpop.f32.mrb[0].mxu1 }
 0x2d0   : > { %v1145_v20 = vmul.f32 %v1141_v19, %v1141_v19  ;;  %v2134_v21 = vpop.f32.mrb[1].mxu0  ;;  %v1239_v23 = vmul.f32 %v1235_v22, %v1235_v22  ;;  %v2153_v25 = vpop.f32.mrb[1].mxu1 }
 0x2d2   : > { %v1147_v24 = vsel %vm1146_vm0, %v1145_v20, 0.0  ;;  %v1241_v26 = vsel %vm1240_vm1, %v1239_v23, 0.0 }
 0x2d3   : > { %1148 = vadd.xlane.f32.xlu1 %v1147_v24 }
 0x2d7   : > { %1242 = vadd.xlane.f32.xlu1 %v1241_v26 }
 0x357   : > { %v1354_v28 = vpop.f32.mrb[2].mxu0 }
 0x358   : > { %v1355_v29 = vadd.f32 %v1991_v27, %v1354_v28  ;;  %v2158_v30 = vpop.f32.mrb[3].mxu0 }
 0x35a   : > { %v1358_v31 = vsel %vm1240_vm1, %v1355_v29, 0.0 }
 0x35b   : > { %v1359_v32 = vrot.slane %v1358_v31, 4 }
 0x35d   : > { %v1360_v33 = vadd.f32 %v1359_v32, %v1358_v31 }
 0x35f   : > { %v1361_v34 = vrot.slane %v1360_v33, 2 }
 0x360   : > { %v1149_v36 = vpop.xlane.xlu1 %1148 }
 0x361   : > { %v1362_v35 = vadd.f32 %v1361_v34, %v1360_v33  ;;  %2348 = vrsqrt.f32 %v1149_v36  ;;  %vm1152_vm2 = vcmp.eq.f32.partialorder %v1149_v36, inf  ;;  %v1155_v44 = vand.u32 2147483648, %v1149_v36 }
 0x362   : > { %vm1154_vm3 = vcmp.eq.f32.partialorder %v1149_v36, 0.0 }
 0x363   : > { %v1363_v37 = vrot.slane %v1362_v35, 1 }
 0x364   : > { %v1243_v39 = vpop.xlane.xlu1 %1242 }
 0x365   : > { %v1364_v38 = vadd.f32 %v1363_v37, %v1362_v35  ;;  %2350 = vrsqrt.f32 %v1243_v39  ;;  %vm1246_vm4 = vcmp.eq.f32.partialorder %v1243_v39, inf  ;;  %v1249_v52 = vand.u32 2147483648, %v1243_v39 }
 0x366   : > { %vm1248_vm5 = vcmp.eq.f32.partialorder %v1243_v39, 0.0 }
 0x367   : > { %v1366_v40 = vmul.f32 0.5, %v1364_v38 }
 0x369   : > { %v1367_v41 = vsub.f32 %v1355_v29, %v1366_v40 }
 0x36b   : > { %v1368_v42 = vmul.f32 %v1367_v41, %v1367_v41  ;;  %v2349_v43 = vpop.eup %2348 }
 0x36c   : > { %v1151_v46 = vmul.f32 %v2349_v43, %v1149_v36 }
 0x36d   : > { %v1369_v45 = vsel %vm1240_vm1, %v1368_v42, 0.0 }
 0x36e   : > { %v1370_v47 = vrot.slane %v1369_v45, 4  ;;  %v1153_v48 = vsel %vm1152_vm2, %v1149_v36, %v1151_v46 }
 0x36f   : > { %v2351_v49 = vpop.eup %2350  ;;  %v1156_v51 = vsel %vm1154_vm3, %v1155_v44, %v1153_v48 }
 0x370   : > { %v1371_v50 = vadd.f32 %v1370_v47, %v1369_v45  ;;  %v1157_v53 = vmax.f32 %v1156_v51, 1e-12  ;;  %v1245_v54 = vmul.f32 %v2351_v49, %v1243_v39 }
 0x372   : > { %v1372_v55 = vrot.slane %v1371_v50, 2  ;;  %2352 = vrcp.f32 %v1157_v53  ;;  %v1247_v56 = vsel %vm1246_vm4, %v1243_v39, %v1245_v54 }
 0x373   : > { %v1250_v58 = vsel %vm1248_vm5, %v1249_v52, %v1247_v56 }
 0x374   : > { %v1373_v57 = vadd.f32 %v1372_v55, %v1371_v50  ;;  %v1251_v59 = vmax.f32 %v1250_v58, 1e-12 }
 0x376   : > { %v1374_v60 = vrot.slane %v1373_v57, 1  ;;  %2354 = vrcp.f32 %v1251_v59 }
 0x378   : > { %v1375_v61 = vadd.f32 %v1374_v60, %v1373_v57 }
 0x37a   : > { %v1376_v62 = vmul.f32 0.5, %v1375_v61 }
 0x37c   : > { %v1377_v63 = vadd.f32 1e-05, %v1376_v62  ;;  %v2353_v0 = vpop.eup %2352 }
 0x37d   : > { %v1159_v1 = vmul.f32 %v2353_v0, %v1141_v19 }
 0x37e   : > { %2356 = vrsqrt.f32 %v1377_v63  ;;  %vm1380_vm6 = vcmp.eq.f32.partialorder %v1377_v63, inf  ;;  %v1383_v6 = vand.u32 2147483648, %v1377_v63  ;;  %vm1382_vm7 = vcmp.eq.f32.partialorder %v1377_v63, 0.0 }
 0x37f   : > { %1160 = vst.msk [vmem:[%s2667_s17] sm:$0x3] %vm1146_vm0, %v1159_v1 }
 0x380   : > { %v2355_v2 = vpop.eup %2354 }
 0x381   : > { %v1253_v3 = vmul.f32 %v2355_v2, %v1235_v22 }
 0x383   : > { %1254 = vst.msk [vmem:[%s2669_s25] sm:$0x3] %vm1240_vm1, %v1253_v3 }
 0x388   : > { %v2357_v4 = vpop.eup %2356 }
 0x389   : > { %v1379_v5 = vmul.f32 %v2357_v4, %v1377_v63 }
 0x38b   : > { %v1381_v7 = vsel %vm1380_vm6, %v1377_v63, %v1379_v5 }
 0x38c   : > { %v1384_v8 = vsel %vm1382_vm7, %v1383_v6, %v1381_v7 }
 0x38d   : > { %2358 = vrcp.f32 %v1384_v8 }
 0x397   : > { %v2359_v9 = vpop.eup %2358 }
 0x398   : > { %v1386_v11 = vmul.f32 %v2359_v9, %v1367_v41 }
 0x39a   : > { %v1394_v13 = vmul.f32 %v1993_v10, %v1386_v11 }
 0x39c   : > { %v1402_v14 = vadd.f32 %v1994_v12, %v1394_v13 }
 0x39e   : > { %v1403_v15 = vmax.f32 %v1402_v14, 0.0 }
 0x3a0   : > { %1404 = vst.msk [vmem:[%s2671_s21] sm:$0x3] %vm1240_vm1, %v1403_v15 }
 0x3a1 PF: > { %p1995_p13 = scmp.ne.s32.totalorder %s2618_s28, 2 }
 0x3a2   : > { %v1411_v16 = vld [vmem:[%s3169_s2 + $0x10] sm:$0xff] (!%p1995_p13)  ;;  %vm1417_vm8 = vcmask (!%p1995_p13), 130048   ;;  %v1409_v17 = vld [vmem:[%s3169_s2] sm:$0xff] (!%p1995_p13)  ;;  %v1412_v18 = vld [vmem:[%s3169_s2 + $0x18] sm:$0xff] (!%p1995_p13)  ;;  %v2501_v24 = vmov (!%p1995_p13), 0.0|0.0   ;;  %vm2502_vm9 = vmmov (!%p1995_p13), 0   ;;  %v1648_v58 = vlaneseq (!%p1995_p13) }
 0x3a3   : > { %1408 = sbr.rel (%p1995_p13) target bundleno = 1370 (0x55a), region = 92  ;;  %v1624_v19 = vsel (!%p1995_p13), %vm1417_vm8, %v1411_v16, 0.0  ;;  %v1415_v20 = vmul.f32 (!%p1995_p13), %v1411_v16, %v1411_v16  ;;  %v1618_v21 = vsel (!%p1995_p13), %vm1417_vm8, %v1409_v17, 0.0  ;;  %v1413_v22 = vmul.f32 (!%p1995_p13), %v1409_v17, %v1409_v17  ;;  %v1410_v23 = vld [vmem:[%s3169_s2 + $0x8] sm:$0xff] (!%p1995_p13)  ;;  %2268 = vmatprep.subr.bf16.mxu0 (!%p1995_p13), %v2501_v24  ;;  %2271 = vmatprep.subr.bf16.mxu1 (!%p1995_p13), %v2501_v24  ;;  %v1436_v25 = vld [vmem:[%s3174_s7] sm:$0xff] (!%p1995_p13) }
 0x3a4   : > { %v1437_v26 = vld [vmem:[%s3174_s7 + $0x8] sm:$0xff] (!%p1995_p13)  ;;  %1625 = vadd.xlane.f32.xlu1 (!%p1995_p13), %v1624_v19  ;;  %1619 = vadd.xlane.f32.xlu0 (!%p1995_p13), %v1618_v21  ;;  %v1416_v27 = vmul.f32 (!%p1995_p13), %v1412_v18, %v1412_v18  ;;  %v1627_v28 = vsel (!%p1995_p13), %vm1417_vm8, %v1412_v18, 0.0  ;;  %v1414_v29 = vmul.f32 (!%p1995_p13), %v1410_v23, %v1410_v23  ;;  %v1621_v30 = vsel (!%p1995_p13), %vm1417_vm8, %v1410_v23, 0.0  ;;  %v1530_v31 = vld [vmem:[%s3175_s8] sm:$0xff] (!%p1995_p13) }
 0x3a5   : > { %v1531_v32 = vld [vmem:[%s3175_s8 + $0x8] sm:$0xff] (!%p1995_p13)  ;;  %v1427_v33 = vsel (!%p1995_p13), %vm1417_vm8, %v1415_v20, 0.0  ;;  %v1418_v34 = vsel (!%p1995_p13), %vm1417_vm8, %v1413_v22, 0.0  ;;  %v2269_v35 = vpack.c.bf16 (!%p1995_p13), %v1437_v26, %v1436_v25  ;;  %v2503_v43 = vmov (!%p1995_p13), 0.0   ;;  %v1635_v55 = vld [vmem:[%s3178_s11] sm:$0xff] (!%p1995_p13) }
 0x3a6   : > { %v2272_v36 = vpack.c.bf16 (!%p1995_p13), %v1531_v32, %v1530_v31  ;;  %v1428_v37 = vsel (!%p1995_p13), %vm1417_vm8, %v1416_v27, 0.0  ;;  %v1419_v38 = vsel (!%p1995_p13), %vm1417_vm8, %v1414_v29, 0.0  ;;  %2163 = vmatprep.mubr.msk.f32.mxu0 (!%p1995_p13), %vm2502_vm9, %v2503_v43  ;;  %2170 = vmatprep.mubr.msk.f32.mxu1 (!%p1995_p13), %vm2502_vm9, %v2503_v43  ;;  %vm1440_vm10 = vcmask (!%p1995_p13), 1041409   ;;  %v1636_v56 = vld [vmem:[%s3178_s11 + $0x8] sm:$0xff] (!%p1995_p13)  ;;  %v1998_v23 = vld [vmem:[%s2655_s29] ss:$0 sm:$0xff] (!%p1995_p13) }
 0x3a7   : > { %v1429_v39 = vadd.f32 (!%p1995_p13), %v1428_v37, %v1427_v33  ;;  %v1420_v40 = vadd.f32 (!%p1995_p13), %v1419_v38, %v1418_v34  ;;  %2270 = vmatpush3.bf16.msra.mxu0 (!%p1995_p13), %v2269_v35  ;;  %v2275_v57 = vpack.c.bf16 (!%p1995_p13), %v1636_v56, %v1635_v55  ;;  %v1649_v59 = vand.u32 (!%p1995_p13), 127, %v1648_v58 }
 0x3a8   : > { %2273 = vmatpush3.bf16.msra.mxu1 (!%p1995_p13), %v2272_v36  ;;  %1628 = vadd.xlane.f32.xlu1 (!%p1995_p13), %v1627_v28  ;;  %v1651_v60 = vshrl.u32 (!%p1995_p13), %v1648_v58, 7  ;;  %vm1659_vm11 = vcmask (!%p1995_p13), 130112   ;;  %vm1603_vm12 = vcmask (!%p1995_p13), 123904   ;;  %vm1515_vm13 = vcmask (!%p1995_p13), 517120  }
 0x3a9   : > { %1622 = vadd.xlane.f32.xlu0 (!%p1995_p13), %v1621_v30  ;;  %v1430_v41 = vrot.slane (!%p1995_p13), %v1429_v39, 4  ;;  %v1421_v42 = vrot.slane (!%p1995_p13), %v1420_v40, 4  ;;  %2274 = vmatprep.subr.bf16.mxu0 (!%p1995_p13), %v2501_v24  ;;  %v1654_v61 = vadd.s32 (!%p1995_p13), 4294967288, %v1649_v59 }
 0x3aa   : > { %v1652_v0 = vsub.s32 %v1649_v59, %v1651_v60 }
 0x3ab   : > { %v1431_v44 = vadd.f32 %v1430_v41, %v1429_v39  ;;  %v1422_v45 = vadd.f32 %v1421_v42, %v1420_v40  ;;  %v1657_v3 = vsub.s32 %v1654_v61, %v1651_v60 }
 0x3ad   : > { %v1432_v46 = vrot.slane %v1431_v44, 2  ;;  %v1423_v47 = vrot.slane %v1422_v45, 2 }
 0x3af   : > { %v1433_v48 = vadd.f32 %v1432_v46, %v1431_v44  ;;  %v1424_v49 = vadd.f32 %v1423_v47, %v1422_v45 }
 0x3b1   : > { %v1425_v50 = vrot.slane %v1424_v49, 1  ;;  %v1434_v51 = vrot.slane %v1433_v48, 1 }
 0x3b3   : > { %v1426_v52 = vadd.f32 %v1425_v50, %v1424_v49  ;;  %v1435_v53 = vadd.f32 %v1434_v51, %v1433_v48 }
 0x3b5   : > { %v1441_v54 = vsel %vm1440_vm10, %v1435_v53, %v1426_v52 }
 0x3b6   : > { %2164 = vmatmul.mubr.msk.f32.vlgmr.msra.gmra.mrb[0].mxu0 %vm1417_vm8, %v1441_v54  ;;  %2171 = vmatmul.mubr.msk.f32.vlgmr.msra.gmra.mrb[0].mxu1 %vm1417_vm8, %v1441_v54 }
 0x3b7   : > { %2177 = vmatprep.mubr.msk.f32.mxu0 %vm2502_vm9, %v2503_v43  ;;  %2276 = vmatpush3.bf16.msra.mxu0 %v2275_v57 }
 0x431   : > { %v1626_v62 = vpop.xlane.xlu1 %1625  ;;  %v1620_v63 = vpop.xlane.xlu0 %1619 }
 0x432   : > { %v1633_v1 = vmul.f32 0.0625, %v1626_v62  ;;  %v1631_v2 = vmul.f32 0.0625, %v1620_v63 }
 0x434   : > { %v1664_v8 = vrot.slane %v1633_v1, %v1652_v0  ;;  %v1653_v9 = vrot.slane %v1631_v2, %v1652_v0 }
 0x435   : > { %v1629_v4 = vpop.xlane.xlu1 %1628 }
 0x436   : > { %v1623_v5 = vpop.xlane.xlu0 %1622  ;;  %v1634_v6 = vmul.f32 0.0625, %v1629_v4 }
 0x437   : > { %v1632_v7 = vmul.f32 0.0625, %v1623_v5 }
 0x438   : > { %v1668_v10 = vrot.slane %v1634_v6, %v1657_v3  ;;  %v2000_v6 = vld [vmem:[%s2660_s0] ss:$0 sm:$0xff] }
 0x439   : > { %v1658_v11 = vrot.slane %v1632_v7, %v1657_v3 }
 0x43a   : > { %v1669_v12 = vsel %vm1659_vm11, %v1668_v10, %v1664_v8  ;;  %v2001_v8 = vld [vmem:[%s2665_s27] ss:$0 sm:$0xff] }
 0x43b   : > { %v1660_v13 = vsel %vm1659_vm11, %v1658_v11, %v1653_v9 }
 0x43c   : > { %v1670_v14 = vsel %vm1440_vm10, %v1669_v12, %v1660_v13 }
 0x43d   : > { %2178 = vmatmul.mubr.msk.f32.vlgmr.msra.gmra.mrb[2].mxu0 %vm1417_vm8, %v1670_v14 }
 0x489   : > { %v1510_v15 = vpop.f32.mrb[0].mxu0  ;;  %v1598_v16 = vpop.f32.mrb[0].mxu1 }
 0x48a   : > { %v1514_v17 = vmul.f32 %v1510_v15, %v1510_v15  ;;  %v1602_v18 = vmul.f32 %v1598_v16, %v1598_v16  ;;  %v2165_v19 = vpop.f32.mrb[1].mxu0  ;;  %v2172_v20 = vpop.f32.mrb[1].mxu1 }
 0x48c   : > { %v1604_v21 = vsel %vm1603_vm12, %v1602_v18, 0.0  ;;  %v1516_v22 = vsel %vm1515_vm13, %v1514_v17, 0.0 }
 0x48d   : > { %1605 = vadd.xlane.f32.xlu1 %v1604_v21  ;;  %1517 = vadd.xlane.f32.xlu0 %v1516_v22 }
 0x510   : > { %v1739_v24 = vpop.f32.mrb[2].mxu0 }
 0x511   : > { %v1740_v25 = vadd.f32 %v1998_v23, %v1739_v24  ;;  %v2179_v26 = vpop.f32.mrb[3].mxu0 }
 0x513   : > { %v1743_v27 = vsel %vm1603_vm12, %v1740_v25, 0.0 }
 0x514   : > { %v1744_v28 = vrot.slane %v1743_v27, 4 }
 0x516   : > { %v1745_v29 = vadd.f32 %v1744_v28, %v1743_v27 }
 0x518   : > { %v1746_v30 = vrot.slane %v1745_v29, 2 }
 0x51a   : > { %v1747_v31 = vadd.f32 %v1746_v30, %v1745_v29  ;;  %v1606_v32 = vpop.xlane.xlu1 %1605  ;;  %v1518_v33 = vpop.xlane.xlu0 %1517 }
 0x51b   : > { %2360 = vrsqrt.f32 %v1606_v32  ;;  %vm1609_vm14 = vcmp.eq.f32.partialorder %v1606_v32, inf  ;;  %vm1611_vm15 = vcmp.eq.f32.partialorder %v1606_v32, 0.0  ;;  %v1612_v41 = vand.u32 2147483648, %v1606_v32 }
 0x51c   : > { %v1748_v34 = vrot.slane %v1747_v31, 1  ;;  %2362 = vrsqrt.f32 %v1518_v33  ;;  %vm1521_vm0 = vcmp.eq.f32.partialorder %v1518_v33, inf  ;;  %v1524_v45 = vand.u32 2147483648, %v1518_v33 }
 0x51d   : > { %vm1523_vm1 = vcmp.eq.f32.partialorder %v1518_v33, 0.0 }
 0x51e   : > { %v1749_v35 = vadd.f32 %v1748_v34, %v1747_v31 }
 0x520   : > { %v1751_v36 = vmul.f32 0.5, %v1749_v35 }
 0x522   : > { %v1752_v37 = vsub.f32 %v1740_v25, %v1751_v36 }
 0x524   : > { %v1753_v38 = vmul.f32 %v1752_v37, %v1752_v37 }
 0x525   : > { %v2361_v39 = vpop.eup %2360 }
 0x526   : > { %v1754_v40 = vsel %vm1603_vm12, %v1753_v38, 0.0  ;;  %v2363_v42 = vpop.eup %2362  ;;  %v1608_v44 = vmul.f32 %v2361_v39, %v1606_v32 }
 0x527   : > { %v1755_v43 = vrot.slane %v1754_v40, 4  ;;  %v1520_v46 = vmul.f32 %v2363_v42, %v1518_v33 }
 0x528   : > { %v1610_v48 = vsel %vm1609_vm14, %v1606_v32, %v1608_v44 }
 0x529   : > { %v1756_v47 = vadd.f32 %v1755_v43, %v1754_v40  ;;  %v1613_v49 = vsel %vm1611_vm15, %v1612_v41, %v1610_v48  ;;  %v1522_v50 = vsel %vm1521_vm0, %v1518_v33, %v1520_v46 }
 0x52a   : > { %v1614_v52 = vmax.f32 %v1613_v49, 1e-12  ;;  %v1525_v53 = vsel %vm1523_vm1, %v1524_v45, %v1522_v50 }
 0x52b   : > { %v1757_v51 = vrot.slane %v1756_v47, 2  ;;  %v1526_v54 = vmax.f32 %v1525_v53, 1e-12 }
 0x52c   : > { %2364 = vrcp.f32 %v1614_v52 }
 0x52d   : > { %v1758_v55 = vadd.f32 %v1757_v51, %v1756_v47  ;;  %2366 = vrcp.f32 %v1526_v54 }
 0x52f   : > { %v1759_v56 = vrot.slane %v1758_v55, 1 }
 0x531   : > { %v1760_v57 = vadd.f32 %v1759_v56, %v1758_v55 }
 0x533   : > { %v1761_v58 = vmul.f32 0.5, %v1760_v57 }
 0x535   : > { %v1762_v59 = vadd.f32 1e-05, %v1761_v58 }
 0x536   : > { %v2365_v60 = vpop.eup %2364 }
 0x537   : > { %2368 = vrsqrt.f32 %v1762_v59  ;;  %v2367_v61 = vpop.eup %2366  ;;  %v1616_v62 = vmul.f32 %v2365_v60, %v1598_v16  ;;  %vm1765_vm2 = vcmp.eq.f32.partialorder %v1762_v59, inf  ;;  %v1768_v2 = vand.u32 2147483648, %v1762_v59 }
 0x538   : > { %v1528_v63 = vmul.f32 %v2367_v61, %v1510_v15  ;;  %vm1767_vm3 = vcmp.eq.f32.partialorder %v1762_v59, 0.0 }
 0x539   : > { %1617 = vst.msk [vmem:[%s2669_s25] sm:$0x3] %vm1603_vm12, %v1616_v62 }
 0x53a   : > { %1529 = vst.msk [vmem:[%s2667_s17] sm:$0x3] %vm1515_vm13, %v1528_v63 }
 0x541   : > { %v2369_v0 = vpop.eup %2368 }
 0x542   : > { %v1764_v1 = vmul.f32 %v2369_v0, %v1762_v59 }
 0x544   : > { %v1766_v3 = vsel %vm1765_vm2, %v1762_v59, %v1764_v1 }
 0x545   : > { %v1769_v4 = vsel %vm1767_vm3, %v1768_v2, %v1766_v3 }
 0x546   : > { %2370 = vrcp.f32 %v1769_v4 }
 0x550   : > { %v2371_v5 = vpop.eup %2370 }
 0x551   : > { %v1771_v7 = vmul.f32 %v2371_v5, %v1752_v37 }
 0x553   : > { %v1779_v9 = vmul.f32 %v2000_v6, %v1771_v7 }
 0x555   : > { %v1787_v10 = vadd.f32 %v2001_v8, %v1779_v9 }
 0x557   : > { %v1788_v11 = vmax.f32 %v1787_v10, 0.0 }
 0x559   : > { %1789 = vst.msk [vmem:[%s2671_s21] sm:$0x3] %vm1603_vm12, %v1788_v11 }
 0x55a PF: > { %s1795_s29 = sand.u32 1, %s2618_s28   ;;  %s3054_s20 = sshll.u32 %s2618_s28, 5 }
 0x55b   : > { %s3060_s0 = scalar_lea.hbm %s3183_s16, %s3054_s20  ;;  %s1827_s27 = sshll.u32 %s2669_s25, 4  ;;  %s3063_s27 = int_to_ptr.vmem [resolvable:$true] %s1827_s27 }
 0x55c   : > { %s3069_s30 = scalar_lea.hbm %s3182_s15, %s3054_s20  ;;  %s3071_s28 = scalar_lea.sflag [#allocation5], %s1795_s29 }
 0x55d   : > { %s2372_s18 = scalar_lea.vmem %s3063_s27, 32  ;;  %s2504_s26 = smov [#allocation4]  }
 0x55e   : > { %p2373_p0 = scmp.ne.s32.totalorder %s3063_s27, %s2372_s18  ;;  %s2376_s19 = sshll.u32 %s2504_s26, 4  ;;  %s2377_s19 = int_to_ptr.vmem [resolvable:$false] %s2376_s19 }
 0x55f   : > { %s2378_s25 = scalar_lea.vmem %s2377_s19, 64  ;;  %p2379_p3 = scmp.lt.s32.totalorder %s3063_s27, %s2377_s19 }
 0x560   : > { %p2374_p1 = pnand %p2373_p0, %p2637_p5  ;;  %p2380_p4 = scmp.lt.s32.totalorder %s2378_s25, %s2372_s18 }
 0x562   : > { %p2375_p2 = pneg %p2374_p1  ;;  %p2381_p7 = por %p2380_p4, %p2379_p3 }
 0x564   : > { %p2382_p8 = pnand %p2381_p7, %p2375_p2 }
 0x566   : > { %2385 = shalt.err (!%p2382_p8)
}
 0x567   : > { %s2386_s24 = scalar_lea.hbm %s3060_s0, 32  ;;  %s2390_s12 = scalar_lea.hbm %s3183_s16, 96 }
 0x568   : > { %p2387_p9 = scmp.ne.s32.totalorder %s3060_s0, %s2386_s24  ;;  %p2391_p12 = scmp.lt.u32.totalorder %s3060_s0, %s3183_s16 }
 0x569   : > { %p2392_p13 = scmp.lt.u32.totalorder %s2390_s12, %s2386_s24  ;;  %p2394_p1 = scmp.lt.u32.totalorder %s2386_s24, %s3060_s0 }
 0x56a   : > { %p2388_p10 = pnand %p2387_p9, %p2637_p5 }
 0x56b   : > { %p2393_p0 = por %p2392_p13, %p2391_p12 }
 0x56c   : > { %p2389_p11 = pneg %p2388_p10 }
 0x56d   : > { %p2395_p2 = por %p2394_p1, %p2393_p0 }
 0x56f   : > { %p2396_p3 = pnand %p2395_p2, %p2389_p11 }
 0x571   : > { %2399 = shalt.err (!%p2396_p3)
}
 0x572   : > { %s3219_s18 = sld [smem:[#allocation10_spill]]  ;;  %s1814_s26 = sshll.u32 %s2667_s17, 4  ;;  %s3102_s26 = int_to_ptr.vmem [resolvable:$true] %s1814_s26 }
 0x573   : > { %2278 = dma.vmem_to_hbm [thread:$0]  (%p2637_p5), %s3063_s27, 32, %s3060_s0, %s3071_s28  }
 0x574   : > { %s3220_s29 = sld [smem:[#allocation21_spill]]  ;;  %s1840_s24 = sshll.u32 %s2671_s21, 4  ;;  %s1841_s24 = int_to_ptr.vmem [resolvable:$true] %s1840_s24 }
 0x575   : > { %s2400_s22 = scalar_lea.vmem %s3102_s26, 32  ;;  %s2505_s0 = smov [#allocation2]  }
 0x576   : > { %p2401_p4 = scmp.ne.s32.totalorder %s3102_s26, %s2400_s22  ;;  %s2404_s17 = sshll.u32 %s2505_s0, 4  ;;  %s2405_s17 = int_to_ptr.vmem [resolvable:$false] %s2404_s17 }
 0x577   : > { %s2406_s27 = scalar_lea.vmem %s2405_s17, 64  ;;  %p2407_p9 = scmp.lt.s32.totalorder %s3102_s26, %s2405_s17 }
 0x578   : > { %s3221_s12 = sand.u32 1, %s3219_s18   ;;  %p2402_p7 = pnand %p2401_p4, %p2637_p5 }
 0x579   : > { %s1791_s13 = scalar_lea.sflag [#allocation3], %s3221_s12  ;;  %p2408_p10 = scmp.lt.s32.totalorder %s2406_s27, %s2400_s22 }
 0x57a   : > { %s3100_s23 = scalar_lea.hbm %s3220_s29, %s3054_s20  ;;  %p2403_p8 = pneg %p2402_p7 }
 0x57b   : > { %p2409_p11 = por %p2408_p10, %p2407_p9 }
 0x57d   : > { %p2410_p12 = pnand %p2409_p11, %p2403_p8 }
 0x57f   : > { %2413 = shalt.err (!%p2410_p12)
}
 0x580   : > { %s2414_s20 = scalar_lea.hbm %s3069_s30, 32  ;;  %s2418_s25 = scalar_lea.hbm %s3182_s15, 96 }
 0x581   : > { %p2415_p13 = scmp.ne.s32.totalorder %s3069_s30, %s2414_s20  ;;  %p2419_p2 = scmp.lt.u32.totalorder %s3069_s30, %s3182_s15 }
 0x582   : > { %p2420_p3 = scmp.lt.u32.totalorder %s2418_s25, %s2414_s20  ;;  %p2422_p7 = scmp.lt.u32.totalorder %s2414_s20, %s3069_s30 }
 0x583   : > { %p2416_p0 = pnand %p2415_p13, %p2637_p5 }
 0x584   : > { %p2421_p4 = por %p2420_p3, %p2419_p2 }
 0x585   : > { %p2417_p1 = pneg %p2416_p0 }
 0x586   : > { %p2423_p8 = por %p2422_p7, %p2421_p4 }
 0x588   : > { %p2424_p9 = pnand %p2423_p8, %p2417_p1 }
 0x58a   : > { %2427 = shalt.err (!%p2424_p9)
}
 0x58b   : > { %2277 = dma.vmem_to_hbm [thread:$0]  (%p2637_p5), %s3102_s26, 32, %s3069_s30, %s1791_s13  }
 0x58c   : > { %s2428_s22 = scalar_lea.vmem %s1841_s24, 32  ;;  %s2506_s17 = smov [#allocation6]  }
 0x58d   : > { %p2429_p10 = scmp.ne.s32.totalorder %s1841_s24, %s2428_s22  ;;  %s2432_s27 = sshll.u32 %s2506_s17, 4  ;;  %s2433_s27 = int_to_ptr.vmem [resolvable:$false] %s2432_s27 }
 0x58e   : > { %s2434_s20 = scalar_lea.vmem %s2433_s27, 64  ;;  %p2435_p13 = scmp.lt.s32.totalorder %s1841_s24, %s2433_s27 }
 0x58f   : > { %p2430_p11 = pnand %p2429_p10, %p2637_p5  ;;  %p2436_p0 = scmp.lt.s32.totalorder %s2434_s20, %s2428_s22 }
 0x591   : > { %p2431_p12 = pneg %p2430_p11  ;;  %p2437_p1 = por %p2436_p0, %p2435_p13 }
 0x593   : > { %p2438_p2 = pnand %p2437_p1, %p2431_p12 }
 0x595   : > { %2441 = shalt.err (!%p2438_p2)
}
 0x596   : > { %s2442_s21 = scalar_lea.hbm %s3100_s23, 32  ;;  %s2446_s13 = scalar_lea.hbm %s3220_s29, 96 }
 0x597   : > { %p2443_p3 = scmp.ne.s32.totalorder %s3100_s23, %s2442_s21  ;;  %p2447_p8 = scmp.lt.u32.totalorder %s3100_s23, %s3220_s29 }
 0x598   : > { %p2448_p9 = scmp.lt.u32.totalorder %s2446_s13, %s2442_s21  ;;  %p2450_p11 = scmp.lt.u32.totalorder %s2442_s21, %s3100_s23 }
 0x599   : > { %p2444_p4 = pnand %p2443_p3, %p2637_p5 }
 0x59a   : > { %p2449_p10 = por %p2448_p9, %p2447_p8 }
 0x59b   : > { %p2445_p7 = pneg %p2444_p4 }
 0x59c   : > { %p2451_p12 = por %p2450_p11, %p2449_p10 }
 0x59e   : > { %p2452_p13 = pnand %p2451_p12, %p2445_p7 }
 0x5a0   : > { %2455 = shalt.err (!%p2452_p13)
}
 0x5a1   : > { %2279 = dma.vmem_to_hbm [thread:$0]  (%p2637_p5), %s1841_s24, 32, %s3100_s23, %s3071_s28  }
 0x5a2 PF: > { %s3222_s25 = sld [smem:[#allocation12_spill]]  ;;  %s3223_s12 = sld [smem:[#allocation9_spill]] }
 0x5a8   : > { %p2293_p0 = scmp.ge.s32.totalorder %s3222_s25, 2  ;;  %s1852_s22 = sand.u32 1, %s3223_s12  }
 0x5a9   : > { %s1853_s17 = scalar_lea.sflag [#allocation3], %s1852_s22 }
 0x5aa   : > { %p2284_p1 = pnand %p2293_p0, %p2641_p6 }
 0x5ac   : > { %2473 = dma.done.wait (!%p2284_p1), %s1853_s17, 32  }
 0x5ad   : > { %2475 = vsyncadd (!%p2284_p1), %s1853_s17, 4294967264  ;;  %s3225_s27 = sadd.s32 4294967294, %s3222_s25  }
 0x5ae   : > { %s1861_s20 = sand.u32 1, %s3225_s27  }
 0x5af   : > { %s1862_s21 = scalar_lea.sflag [#allocation5], %s1861_s20 }
 0x5b0   : > { %2477 = dma.done.wait (!%p2284_p1), %s1862_s21, 64  }
 0x5b1   : > { %2479 = vsyncadd (!%p2284_p1), %s1862_s21, 4294967232  ;;  %s3226_s27 = sld [smem:[#allocation13_spill]]  ;;  %s3227_s24 = sld [smem:[#allocation10_spill]] }
 0x5b2   : > { %s3228_s25 = sld [smem:[#allocation11_spill]]  ;;  %s3229_s26 = sld [smem:[#allocation14_spill]] }
 0x5b7   : > { %p31_p5 = scmp.ge.s32.totalorder %s3226_s27, 5  }
 0x5b9   :  { %33 = sbr.rel (!%p31_p5) target bundleno = 12 (0xc), region = 165 }
 0x5c0   :  { %1876 = vsyncpa [#allocation3], 1 }
 0x5c1   :  { %1878 = vsyncpa [#allocation3 + $0x1], 1 }
 0x5c2   :  { %1879 = vsyncpa [#allocation5], 1 }
 0x5c3   :  { %1881 = vsyncpa [#allocation5 + $0x1], 1 }

</bundles_post_ra>
